<compile_context>
chip_gen: v5e
topology: v5e:2x2
jax: 0.10.0
libtpu: 0.0.40
codegen_flags: <defaults>
</compile_context>

<pallas_src>
import jax
import jax.numpy as jnp
from jax import lax
from jax.experimental import pallas as pl
from jax.experimental.pallas import tpu as pltpu

BATCH = 2             # independent feature sets (same graphs) -> grid / megacore axis
N_NODES = 16          # number of graph nodes / spots
IN_CH = 32            # in_ch = out_ch for every MFUnit
SCALES = 3            # MSUnit default scales
NEG_SLOPE = 0.2       # GATConv default negative_slope
NEG_MASK = -1e30      # additive log-mask for non-edges


# ---------------------------------------------------------------------------
# Fused MSUnit kernel (one batch element per grid step)
# ---------------------------------------------------------------------------
def _msunit_kernel(x_ref, adjlog_ref, gw_ref, wsrc_ref, gb_ref, scw_ref, scb_ref,
                   o_ref):
    n, c = x_ref.shape
    adjlog = adjlog_ref[...]                              # [3, N, N]: sp / om1 / om2

    # --- GATConv pieces -----------------------------------------------------
    def gat_common(x, s):
        """Shared linear + attention logits for unit `s` (att vectors pre-folded)."""
        # alpha_src row: independent of the main matmul (both consume only x), so it
        # overlaps with it instead of extending the dependent chain.
        a_src = lax.dot_general(wsrc_ref[s], x, (((1,), (1,)), ((), ())),
                                preferred_element_type=jnp.float32)          # [1, N]
        hf = jnp.dot(x, gw_ref[s], preferred_element_type=jnp.float32)       # [N, C+1]
        h = hf[:, :c]                                                         # [N, C]
        a_dst = hf[:, c:c + 1]                                                # [N, 1]
        e = a_dst + a_src                                                     # e[dst, src]
        e = jnp.where(e > 0.0, e, NEG_SLOPE * e)                              # leaky_relu
        return h, e

    def gat_aggregate(h, e, bias, logmask):
        """Masked softmax over incoming edges + aggregation (PyG GATConv).

        Self-loops guarantee every row has one unmasked (finite) entry, so the
        denominator is >= 1 after max-subtraction; masked entries underflow to 0.
        """
        em = e + logmask
        em = em - jnp.max(em, axis=-1, keepdims=True)
        p = jnp.exp(em)
        attn = p * pl.reciprocal(jnp.sum(p, axis=-1, keepdims=True), approx=True)
        return jnp.dot(attn, h, preferred_element_type=jnp.float32) + bias

    # --- SC_attn: ONE fused projection matmul + fused score / value matmuls ---
    def sc_attn(s, sp, om1, om2):
        xin = jnp.concatenate([sp, om1, om2], axis=-1)                        # [N, 3C]
        # [ q*inv_sqrt_c | k1 | k2 | v | conf1_pre | conf2_pre ], biases folded.
        proj = (jnp.dot(xin, scw_ref[s], preferred_element_type=jnp.float32)
                + scb_ref[s])                                                 # [N, 6C]
        q = proj[:, 0:c]                   # already scaled by 1/sqrt(C)
        k1 = proj[:, c:2 * c]
        k2 = proj[:, 2 * c:3 * c]
        v = proj[:, 3 * c:4 * c]
        # NOTE: reference SC_attn applies self.conf1 to BOTH [sp, om1] and [sp, om2]
        # (conf2's weights are unused in forward) -- reproduced exactly at pack time.
        conf1 = jax.nn.sigmoid(proj[:, 4 * c:5 * c])
        conf2 = jax.nn.sigmoid(proj[:, 5 * c:6 * c])

        # One score push for both branches: q @ [k1; k2]^T -> [N, 2N].
        kcat = jnp.concatenate([k1, k2], axis=0)                              # [2N, C]
        sco = lax.dot_general(q, kcat, (((1,), (1,)), ((), ())),
                              preferred_element_type=jnp.float32)             # [N, 2N]

        def row_softmax(scores):
            scores = scores - jnp.max(scores, axis=-1, keepdims=True)
            p = jnp.exp(scores)
            return p * pl.reciprocal(jnp.sum(p, axis=-1, keepdims=True), approx=True)

        p1 = row_softmax(sco[:, :n])
        p2 = row_softmax(sco[:, n:])
        # One value push for both branches: [2N, N] @ [N, C].
        av = jnp.dot(jnp.concatenate([p1, p2], axis=0), v,
                     preferred_element_type=jnp.float32)                      # [2N, C]
        a1, a2 = av[:n], av[n:]

        # softmax over the 2 confidence maps (sigmoid outputs in (0,1): exp is safe)
        e1, e2 = jnp.exp(conf1), jnp.exp(conf2)
        inv = pl.reciprocal(e1 + e2, approx=True)
        return (e1 * a1 + e2 * a2) * inv

    # --- MSUnit forward -------------------------------------------------------
    # Unit 0: one GAT linear, three masked-softmax branches (sp / om1 / om2 graphs).
    h0, e0 = gat_common(x_ref[...], 0)
    b0 = gb_ref[0]
    sp0 = gat_aggregate(h0, e0, b0, adjlog[0])
    om1_emb = gat_aggregate(h0, e0, b0, adjlog[1])
    om2_emb = gat_aggregate(h0, e0, b0, adjlog[2])

    emb = sc_attn(0, sp0, om1_emb, om2_emb)
    embs = [emb]
    # Units 1..S-1: GAT on the spatial graph only; om1/om2 embeddings are reused
    # (their shape[0] != 2 so the reference passes them straight through).
    for s in range(1, SCALES):
        h, e = gat_common(emb, s)
        sp_s = gat_aggregate(h, e, gb_ref[s], adjlog[0])
        emb = sc_attn(s, sp_s, om1_emb, om2_emb)
        embs.append(emb)

    # One lane-dense, 128-lane-padded store (unmasked vst) instead of narrow stores.
    slab = jnp.concatenate(embs, axis=-1)                                     # [N, S*C]
    pad = o_ref.shape[-1] - SCALES * c
    if pad > 0:
        slab = jnp.concatenate([slab, jnp.zeros((n, pad), jnp.float32)], axis=-1)
    o_ref[...] = slab


@jax.jit
def msunit_forward(params, omics, adj_logmask):
    """omics: [B, N, C]; adj_logmask: [3, N, N] additive mask (built outside the jit)."""
    b, n, c = omics.shape
    out_lanes = ((SCALES * c + 127) // 128) * 128          # pad to full 128-lane slab
    const3 = lambda i: (0, 0, 0)
    out = pl.pallas_call(
        _msunit_kernel,
        grid=(b,),
        out_shape=jax.ShapeDtypeStruct((b, n, out_lanes), jnp.float32),
        in_specs=[
            pl.BlockSpec((None, n, c), lambda i: (i, 0, 0)),        # omics (per batch)
            pl.BlockSpec(adj_logmask.shape, const3),                # [3, N, N] log-mask
            pl.BlockSpec(params["gat_w"].shape, const3),            # [S, C, C+1]
            pl.BlockSpec(params["gat_src"].shape, const3),          # [S, 1, C]
            pl.BlockSpec(params["gat_b"].shape, const3),            # [S, 1, C]
            pl.BlockSpec(params["sc_w"].shape, const3),             # [S, 3C, 6C]
            pl.BlockSpec(params["sc_b"].shape, const3),             # [S, 1, 6C]
        ],
        out_specs=pl.BlockSpec((None, n, out_lanes), lambda i: (i, 0, 0)),
        compiler_params=pltpu.CompilerParams(
            dimension_semantics=("parallel",)),                     # megacore on v7x
    )(omics, adj_logmask, params["gat_w"], params["gat_src"], params["gat_b"],
      params["sc_w"], params["sc_b"])
    return [out[:, :, i * c:(i + 1) * c] for i in range(SCALES)]


# ---------------------------------------------------------------------------
# Deterministic parameter init (shapes follow the nn.Module __init__) + packing
# ---------------------------------------------------------------------------
def _linear(key, fan_in, fan_out):
    kw, kb = jax.random.split(key)
    return (jax.random.normal(kw, (fan_in, fan_out), jnp.float32) * 0.1,
            jax.random.normal(kb, (1, fan_out), jnp.float32) * 0.01)


def _gat_params(key, fan_in, fan_out):
    k = jax.random.split(key, 4)
    return {"w": jax.random.normal(k[0], (fan_in, fan_out), jnp.float32) * 0.1,
            "att_src": jax.random.normal(k[1], (1, fan_out), jnp.float32) * 0.1,
            "att_dst": jax.random.normal(k[2], (1, fan_out), jnp.float32) * 0.1,
            "bias": jax.random.normal(k[3], (1, fan_out), jnp.float32) * 0.01}


def pack_params(units, c):
    """Pack per-unit nn.Module weights into the kernel's fused / folded layout."""
    inv_sqrt_c = 1.0 / (c ** 0.5)
    z = jnp.zeros((c, c), jnp.float32)
    gat_w, gat_src, gat_b, sc_w, sc_b = [], [], [], [], []
    for u in units:
        g = u["gat"]
        # [C, C+1]: W | W @ att_dst^T  -> h and per-node alpha_dst from one matmul.
        gat_w.append(jnp.concatenate([g["w"], g["w"] @ g["att_dst"].T], axis=1))
        # alpha_src weight pre-folded through W: [1, C], contracted against x directly.
        gat_src.append(g["att_src"] @ g["w"].T)
        gat_b.append(g["bias"])

        # Fused SC_attn RHS [3C, 6C]: columns = [ q | k1 | k2 | v | conf1 | conf2 ],
        # rows = [sp | om1 | om2] halves of the concatenated input. 1/sqrt(C) folded
        # into the q block; conf2 reuses conf1's weights (reference forward bug).
        wq = u["wq"] * inv_sqrt_c
        wc_sp, wc_om = u["wc"][0:c], u["wc"][c:2 * c]
        r = jnp.concatenate([
            jnp.concatenate([wq, z, z, u["wv"][0:c],          wc_sp, wc_sp], axis=1),
            jnp.concatenate([z, u["wk1"], z, u["wv"][c:2 * c], wc_om, z],     axis=1),
            jnp.concatenate([z, z, u["wk2"], u["wv"][2 * c:3 * c], z, wc_om], axis=1),
        ], axis=0)
        sc_w.append(r)
        sc_b.append(jnp.concatenate([u["bq"] * inv_sqrt_c, u["bk1"], u["bk2"],
                                     u["bv"], u["bc"], u["bc"]], axis=1))
    return {"gat_w": jnp.stack(gat_w),          # [S, C, C+1]
            "gat_src": jnp.stack(gat_src),      # [S, 1, C]
            "gat_b": jnp.stack(gat_b),          # [S, 1, C]
            "sc_w": jnp.stack(sc_w),            # [S, 3C, 6C]
            "sc_b": jnp.stack(sc_b)}            # [S, 1, 6C]


def init_params(key, c, scales):
    units = []
    for kk in jax.random.split(key, scales):
        kg, kq, kk1, kk2, kv, kc = jax.random.split(kk, 6)
        wq, bq = _linear(kq, c, c)
        wk1, bk1 = _linear(kk1, c, c)
        wk2, bk2 = _linear(kk2, c, c)
        wv, bv = _linear(kv, 3 * c, c)
        wc, bc = _linear(kc, 2 * c, c)     # conf1 weights (conf2 unused in forward)
        units.append({"gat": _gat_params(kg, c, c),
                      "wq": wq, "bq": bq, "wk1": wk1, "bk1": bk1,
                      "wk2": wk2, "bk2": bk2, "wv": wv, "bv": bv,
                      "wc": wc, "bc": bc})
    return pack_params(units, c)


# ---------------------------------------------------------------------------
# Graph helpers (edge_index [2, E] -> dense additive log-mask with self-loops).
# Built ONCE outside the jitted per-step forward (review item).
# ---------------------------------------------------------------------------
def _ring_edges(n, offset):
    src = jnp.arange(n, dtype=jnp.int32)
    dst = jnp.mod(src + offset, n)
    return jnp.stack([jnp.concatenate([src, dst]),
                      jnp.concatenate([dst, src])], axis=0)        # [2, 2n]


def edges_to_adj(edge_index, n):
    src, dst = edge_index[0], edge_index[1]
    adj = jnp.zeros((n, n), jnp.float32).at[dst, src].set(1.0)
    return jnp.maximum(adj, jnp.eye(n, dtype=jnp.float32))         # add_self_loops=True


def build_adj_logmask(sp_net, om1_net, om2_net, n):
    adj3 = jnp.stack([edges_to_adj(e, n) for e in (sp_net, om1_net, om2_net)], axis=0)
    return jnp.where(adj3 > 0.0, 0.0, NEG_MASK).astype(jnp.float32)


# ---------------------------------------------------------------------------
if __name__ == "__main__":
    key = jax.random.PRNGKey(0)
    kp, kx = jax.random.split(key)
    params = init_params(kp, IN_CH, SCALES)

    omics = jax.random.normal(kx, (BATCH, N_NODES, IN_CH), jnp.float32)
    sp_net = _ring_edges(N_NODES, 1)    # PyG-style edge_index tensors
    om1_net = _ring_edges(N_NODES, 2)
    om2_net = _ring_edges(N_NODES, 3)
    adj_logmask = build_adj_logmask(sp_net, om1_net, om2_net, N_NODES)

    embs = msunit_forward(params, omics, adj_logmask)
    embs = jax.block_until_ready(embs)

    assert len(embs) == SCALES
    for e in embs:
        assert e.shape == (BATCH, N_NODES, IN_CH)
        assert bool(jnp.all(jnp.isfinite(e)))
    print("KERNEL_OK")
</pallas_src>

<mosaic_0001>
module attributes {stable_mosaic.version = 11 : i64} {
  func.func @_msunit_kernel(%arg0: i32, %arg1: memref<1x16x32xf32, #tpu.memory_space<vmem>>, %arg2: memref<3x16x16xf32, #tpu.memory_space<vmem>>, %arg3: memref<3x32x33xf32, #tpu.memory_space<vmem>>, %arg4: memref<3x1x32xf32, #tpu.memory_space<vmem>>, %arg5: memref<3x1x32xf32, #tpu.memory_space<vmem>>, %arg6: memref<3x96x192xf32, #tpu.memory_space<vmem>>, %arg7: memref<3x1x192xf32, #tpu.memory_space<vmem>>, %arg8: memref<1x16x128xf32, #tpu.memory_space<vmem>>) attributes {dimension_semantics = [#tpu.dimension_semantics<parallel>], iteration_bounds = array<i64: 2>, scalar_prefetch = 0 : i64, scratch_operands = 0 : i64, tpu.core_type = #tpu.core_type<tc>, window_params = [{transform_indices = @transform_0, window_bounds = array<i64: 1, 16, 32>}, {pipeline_mode = #tpu.pipeline_mode<synchronous>, transform_indices = @transform_1, window_bounds = array<i64: 3, 16, 16>}, {pipeline_mode = #tpu.pipeline_mode<synchronous>, transform_indices = @transform_2, window_bounds = array<i64: 3, 32, 33>}, {pipeline_mode = #tpu.pipeline_mode<synchronous>, transform_indices = @transform_3, window_bounds = array<i64: 3, 1, 32>}, {pipeline_mode = #tpu.pipeline_mode<synchronous>, transform_indices = @transform_4, window_bounds = array<i64: 3, 1, 32>}, {pipeline_mode = #tpu.pipeline_mode<synchronous>, transform_indices = @transform_5, window_bounds = array<i64: 3, 96, 192>}, {pipeline_mode = #tpu.pipeline_mode<synchronous>, transform_indices = @transform_6, window_bounds = array<i64: 3, 1, 192>}, {transform_indices = @transform_7, window_bounds = array<i64: 1, 16, 128>}]} {
    %c0 = arith.constant 0 : index
    %c0_0 = arith.constant 0 : index
    %c0_1 = arith.constant 0 : index
    %0 = vector.load %arg2[%c0, %c0_0, %c0_1] : memref<3x16x16xf32, #tpu.memory_space<vmem>>, vector<3x16x16xf32>
    %c0_2 = arith.constant 0 : index
    %c0_3 = arith.constant 0 : index
    %c0_4 = arith.constant 0 : index
    %1 = vector.load %arg1[%c0_2, %c0_3, %c0_4] : memref<1x16x32xf32, #tpu.memory_space<vmem>>, vector<1x16x32xf32>
    %2 = vector.shape_cast %1 : vector<1x16x32xf32> to vector<16x32xf32>
    %c0_5 = arith.constant 0 : index
    %c0_6 = arith.constant 0 : index
    %c0_7 = arith.constant 0 : index
    %3 = vector.load %arg4[%c0_5, %c0_6, %c0_7] : memref<3x1x32xf32, #tpu.memory_space<vmem>>, vector<1x1x32xf32>
    %4 = vector.shape_cast %3 : vector<1x1x32xf32> to vector<1x32xf32>
    %cst = arith.constant dense<0.000000e+00> : vector<1x16xf32>
    %5 = tpu.matmul %4, %2, %cst {dimension_numbers = #tpu.dot_dimension_numbers<[1], [1], [0], [0], [0, 0, 1, 0], [], []>} : vector<1x32xf32>, vector<16x32xf32>, vector<1x16xf32> -> vector<1x16xf32>
    %c0_8 = arith.constant 0 : index
    %c0_9 = arith.constant 0 : index
    %c0_10 = arith.constant 0 : index
    %6 = vector.load %arg3[%c0_8, %c0_9, %c0_10] : memref<3x32x33xf32, #tpu.memory_space<vmem>>, vector<1x32x33xf32>
    %7 = vector.shape_cast %6 : vector<1x32x33xf32> to vector<32x33xf32>
    %cst_11 = arith.constant dense<0.000000e+00> : vector<16x33xf32>
    %8 = tpu.matmul %2, %7, %cst_11 {dimension_numbers = #tpu.dot_dimension_numbers<[1], [0], [0], [1], [0, 0, 1, 1], [], []>} : vector<16x32xf32>, vector<32x33xf32>, vector<16x33xf32> -> vector<16x33xf32>
    %9 = vector.extract_strided_slice %8 {offsets = [0, 0], sizes = [16, 32], strides = [1, 1]} : vector<16x33xf32> to vector<16x32xf32>
    %10 = vector.extract_strided_slice %8 {offsets = [0, 32], sizes = [16, 1], strides = [1, 1]} : vector<16x33xf32> to vector<16x1xf32>
    %11 = vector.broadcast %10 : vector<16x1xf32> to vector<16x16xf32>
    %12 = vector.broadcast %5 : vector<1x16xf32> to vector<16x16xf32>
    %13 = arith.addf %11, %12 : vector<16x16xf32>
    %cst_12 = arith.constant 0.000000e+00 : f32
    %14 = vector.broadcast %cst_12 : f32 to vector<16x16xf32>
    %15 = arith.cmpf ogt, %13, %14 : vector<16x16xf32>
    %cst_13 = arith.constant 2.000000e-01 : f32
    %16 = vector.broadcast %cst_13 : f32 to vector<16x16xf32>
    %17 = arith.mulf %16, %13 : vector<16x16xf32>
    %18 = arith.select %15, %13, %17 : vector<16x16xi1>, vector<16x16xf32>
    %c0_14 = arith.constant 0 : index
    %c0_15 = arith.constant 0 : index
    %c0_16 = arith.constant 0 : index
    %19 = vector.load %arg5[%c0_14, %c0_15, %c0_16] : memref<3x1x32xf32, #tpu.memory_space<vmem>>, vector<1x1x32xf32>
    %20 = vector.shape_cast %19 : vector<1x1x32xf32> to vector<1x32xf32>
    %21 = vector.extract_strided_slice %0 {offsets = [0, 0, 0], sizes = [1, 16, 16], strides = [1, 1, 1]} : vector<3x16x16xf32> to vector<1x16x16xf32>
    %22 = vector.shape_cast %21 : vector<1x16x16xf32> to vector<16x16xf32>
    %23 = arith.addf %18, %22 : vector<16x16xf32>
    %cst_17 = arith.constant dense<0xFF800000> : vector<16xf32>
    %24 = vector.multi_reduction <maximumf>, %23, %cst_17 [1] : vector<16x16xf32> to vector<16xf32>
    %25 = vector.shape_cast %24 : vector<16xf32> to vector<16x1xf32>
    %26 = vector.broadcast %25 : vector<16x1xf32> to vector<16x16xf32>
    %27 = arith.subf %23, %26 : vector<16x16xf32>
    %28 = math.exp %27 : vector<16x16xf32>
    %cst_18 = arith.constant dense<0.000000e+00> : vector<16xf32>
    %29 = vector.multi_reduction <add>, %28, %cst_18 [1] : vector<16x16xf32> to vector<16xf32>
    %30 = vector.shape_cast %29 : vector<16xf32> to vector<16x1xf32>
    %31 = tpu.reciprocal %30 {approx = true} : vector<16x1xf32> -> vector<16x1xf32>
    %32 = vector.broadcast %31 : vector<16x1xf32> to vector<16x16xf32>
    %33 = arith.mulf %28, %32 : vector<16x16xf32>
    %cst_19 = arith.constant dense<0.000000e+00> : vector<16x32xf32>
    %34 = tpu.matmul %33, %9, %cst_19 {dimension_numbers = #tpu.dot_dimension_numbers<[1], [0], [0], [1], [0, 0, 1, 1], [], []>} : vector<16x16xf32>, vector<16x32xf32>, vector<16x32xf32> -> vector<16x32xf32>
    %35 = vector.broadcast %20 : vector<1x32xf32> to vector<16x32xf32>
    %36 = arith.addf %34, %35 : vector<16x32xf32>
    %37 = vector.extract_strided_slice %0 {offsets = [1, 0, 0], sizes = [1, 16, 16], strides = [1, 1, 1]} : vector<3x16x16xf32> to vector<1x16x16xf32>
    %38 = vector.shape_cast %37 : vector<1x16x16xf32> to vector<16x16xf32>
    %39 = arith.addf %18, %38 : vector<16x16xf32>
    %cst_20 = arith.constant dense<0xFF800000> : vector<16xf32>
    %40 = vector.multi_reduction <maximumf>, %39, %cst_20 [1] : vector<16x16xf32> to vector<16xf32>
    %41 = vector.shape_cast %40 : vector<16xf32> to vector<16x1xf32>
    %42 = vector.broadcast %41 : vector<16x1xf32> to vector<16x16xf32>
    %43 = arith.subf %39, %42 : vector<16x16xf32>
    %44 = math.exp %43 : vector<16x16xf32>
    %cst_21 = arith.constant dense<0.000000e+00> : vector<16xf32>
    %45 = vector.multi_reduction <add>, %44, %cst_21 [1] : vector<16x16xf32> to vector<16xf32>
    %46 = vector.shape_cast %45 : vector<16xf32> to vector<16x1xf32>
    %47 = tpu.reciprocal %46 {approx = true} : vector<16x1xf32> -> vector<16x1xf32>
    %48 = vector.broadcast %47 : vector<16x1xf32> to vector<16x16xf32>
    %49 = arith.mulf %44, %48 : vector<16x16xf32>
    %cst_22 = arith.constant dense<0.000000e+00> : vector<16x32xf32>
    %50 = tpu.matmul %49, %9, %cst_22 {dimension_numbers = #tpu.dot_dimension_numbers<[1], [0], [0], [1], [0, 0, 1, 1], [], []>} : vector<16x16xf32>, vector<16x32xf32>, vector<16x32xf32> -> vector<16x32xf32>
    %51 = vector.broadcast %20 : vector<1x32xf32> to vector<16x32xf32>
    %52 = arith.addf %50, %51 : vector<16x32xf32>
    %53 = vector.extract_strided_slice %0 {offsets = [2, 0, 0], sizes = [1, 16, 16], strides = [1, 1, 1]} : vector<3x16x16xf32> to vector<1x16x16xf32>
    %54 = vector.shape_cast %53 : vector<1x16x16xf32> to vector<16x16xf32>
    %55 = arith.addf %18, %54 : vector<16x16xf32>
    %cst_23 = arith.constant dense<0xFF800000> : vector<16xf32>
    %56 = vector.multi_reduction <maximumf>, %55, %cst_23 [1] : vector<16x16xf32> to vector<16xf32>
    %57 = vector.shape_cast %56 : vector<16xf32> to vector<16x1xf32>
    %58 = vector.broadcast %57 : vector<16x1xf32> to vector<16x16xf32>
    %59 = arith.subf %55, %58 : vector<16x16xf32>
    %60 = math.exp %59 : vector<16x16xf32>
    %cst_24 = arith.constant dense<0.000000e+00> : vector<16xf32>
    %61 = vector.multi_reduction <add>, %60, %cst_24 [1] : vector<16x16xf32> to vector<16xf32>
    %62 = vector.shape_cast %61 : vector<16xf32> to vector<16x1xf32>
    %63 = tpu.reciprocal %62 {approx = true} : vector<16x1xf32> -> vector<16x1xf32>
    %64 = vector.broadcast %63 : vector<16x1xf32> to vector<16x16xf32>
    %65 = arith.mulf %60, %64 : vector<16x16xf32>
    %cst_25 = arith.constant dense<0.000000e+00> : vector<16x32xf32>
    %66 = tpu.matmul %65, %9, %cst_25 {dimension_numbers = #tpu.dot_dimension_numbers<[1], [0], [0], [1], [0, 0, 1, 1], [], []>} : vector<16x16xf32>, vector<16x32xf32>, vector<16x32xf32> -> vector<16x32xf32>
    %67 = vector.broadcast %20 : vector<1x32xf32> to vector<16x32xf32>
    %68 = arith.addf %66, %67 : vector<16x32xf32>
    %69 = tpu.concatenate %36, %52, %68 in 1 : vector<16x32xf32>, vector<16x32xf32>, vector<16x32xf32> -> vector<16x96xf32>
    %c0_26 = arith.constant 0 : index
    %c0_27 = arith.constant 0 : index
    %c0_28 = arith.constant 0 : index
    %70 = vector.load %arg6[%c0_26, %c0_27, %c0_28] : memref<3x96x192xf32, #tpu.memory_space<vmem>>, vector<1x96x192xf32>
    %71 = vector.shape_cast %70 : vector<1x96x192xf32> to vector<96x192xf32>
    %cst_29 = arith.constant dense<0.000000e+00> : vector<16x192xf32>
    %72 = tpu.matmul %69, %71, %cst_29 {dimension_numbers = #tpu.dot_dimension_numbers<[1], [0], [0], [1], [0, 0, 1, 1], [], []>} : vector<16x96xf32>, vector<96x192xf32>, vector<16x192xf32> -> vector<16x192xf32>
    %c0_30 = arith.constant 0 : index
    %c0_31 = arith.constant 0 : index
    %c0_32 = arith.constant 0 : index
    %73 = vector.load %arg7[%c0_30, %c0_31, %c0_32] : memref<3x1x192xf32, #tpu.memory_space<vmem>>, vector<1x1x192xf32>
    %74 = vector.shape_cast %73 : vector<1x1x192xf32> to vector<1x192xf32>
    %75 = vector.broadcast %74 : vector<1x192xf32> to vector<16x192xf32>
    %76 = arith.addf %72, %75 : vector<16x192xf32>
    %77 = vector.extract_strided_slice %76 {offsets = [0, 0], sizes = [16, 32], strides = [1, 1]} : vector<16x192xf32> to vector<16x32xf32>
    %78 = vector.extract_strided_slice %76 {offsets = [0, 32], sizes = [16, 32], strides = [1, 1]} : vector<16x192xf32> to vector<16x32xf32>
    %79 = vector.extract_strided_slice %76 {offsets = [0, 64], sizes = [16, 32], strides = [1, 1]} : vector<16x192xf32> to vector<16x32xf32>
    %80 = vector.extract_strided_slice %76 {offsets = [0, 96], sizes = [16, 32], strides = [1, 1]} : vector<16x192xf32> to vector<16x32xf32>
    %81 = vector.extract_strided_slice %76 {offsets = [0, 128], sizes = [16, 32], strides = [1, 1]} : vector<16x192xf32> to vector<16x32xf32>
    %82 = arith.negf %81 : vector<16x32xf32>
    %83 = math.exp %82 : vector<16x32xf32>
    %cst_33 = arith.constant 1.000000e+00 : f32
    %84 = vector.broadcast %cst_33 : f32 to vector<16x32xf32>
    %85 = arith.addf %84, %83 : vector<16x32xf32>
    %86 = arith.divf %84, %85 : vector<16x32xf32>
    %87 = vector.extract_strided_slice %76 {offsets = [0, 160], sizes = [16, 32], strides = [1, 1]} : vector<16x192xf32> to vector<16x32xf32>
    %88 = arith.negf %87 : vector<16x32xf32>
    %89 = math.exp %88 : vector<16x32xf32>
    %cst_34 = arith.constant 1.000000e+00 : f32
    %90 = vector.broadcast %cst_34 : f32 to vector<16x32xf32>
    %91 = arith.addf %90, %89 : vector<16x32xf32>
    %92 = arith.divf %90, %91 : vector<16x32xf32>
    %93 = tpu.concatenate %78, %79 in 0 : vector<16x32xf32>, vector<16x32xf32> -> vector<32x32xf32>
    %cst_35 = arith.constant dense<0.000000e+00> : vector<16x32xf32>
    %94 = tpu.matmul %77, %93, %cst_35 {dimension_numbers = #tpu.dot_dimension_numbers<[1], [1], [0], [0], [0, 0, 1, 0], [], []>} : vector<16x32xf32>, vector<32x32xf32>, vector<16x32xf32> -> vector<16x32xf32>
    %95 = vector.extract_strided_slice %94 {offsets = [0, 0], sizes = [16, 16], strides = [1, 1]} : vector<16x32xf32> to vector<16x16xf32>
    %cst_36 = arith.constant dense<0xFF800000> : vector<16xf32>
    %96 = vector.multi_reduction <maximumf>, %95, %cst_36 [1] : vector<16x16xf32> to vector<16xf32>
    %97 = vector.shape_cast %96 : vector<16xf32> to vector<16x1xf32>
    %98 = vector.broadcast %97 : vector<16x1xf32> to vector<16x16xf32>
    %99 = arith.subf %95, %98 : vector<16x16xf32>
    %100 = math.exp %99 : vector<16x16xf32>
    %cst_37 = arith.constant dense<0.000000e+00> : vector<16xf32>
    %101 = vector.multi_reduction <add>, %100, %cst_37 [1] : vector<16x16xf32> to vector<16xf32>
    %102 = vector.shape_cast %101 : vector<16xf32> to vector<16x1xf32>
    %103 = tpu.reciprocal %102 {approx = true} : vector<16x1xf32> -> vector<16x1xf32>
    %104 = vector.broadcast %103 : vector<16x1xf32> to vector<16x16xf32>
    %105 = arith.mulf %100, %104 : vector<16x16xf32>
    %106 = vector.extract_strided_slice %94 {offsets = [0, 16], sizes = [16, 16], strides = [1, 1]} : vector<16x32xf32> to vector<16x16xf32>
    %cst_38 = arith.constant dense<0xFF800000> : vector<16xf32>
    %107 = vector.multi_reduction <maximumf>, %106, %cst_38 [1] : vector<16x16xf32> to vector<16xf32>
    %108 = vector.shape_cast %107 : vector<16xf32> to vector<16x1xf32>
    %109 = vector.broadcast %108 : vector<16x1xf32> to vector<16x16xf32>
    %110 = arith.subf %106, %109 : vector<16x16xf32>
    %111 = math.exp %110 : vector<16x16xf32>
    %cst_39 = arith.constant dense<0.000000e+00> : vector<16xf32>
    %112 = vector.multi_reduction <add>, %111, %cst_39 [1] : vector<16x16xf32> to vector<16xf32>
    %113 = vector.shape_cast %112 : vector<16xf32> to vector<16x1xf32>
    %114 = tpu.reciprocal %113 {approx = true} : vector<16x1xf32> -> vector<16x1xf32>
    %115 = vector.broadcast %114 : vector<16x1xf32> to vector<16x16xf32>
    %116 = arith.mulf %111, %115 : vector<16x16xf32>
    %117 = tpu.concatenate %105, %116 in 0 : vector<16x16xf32>, vector<16x16xf32> -> vector<32x16xf32>
    %cst_40 = arith.constant dense<0.000000e+00> : vector<32x32xf32>
    %118 = tpu.matmul %117, %80, %cst_40 {dimension_numbers = #tpu.dot_dimension_numbers<[1], [0], [0], [1], [0, 0, 1, 1], [], []>} : vector<32x16xf32>, vector<16x32xf32>, vector<32x32xf32> -> vector<32x32xf32>
    %119 = vector.extract_strided_slice %118 {offsets = [0, 0], sizes = [16, 32], strides = [1, 1]} : vector<32x32xf32> to vector<16x32xf32>
    %120 = vector.extract_strided_slice %118 {offsets = [16, 0], sizes = [16, 32], strides = [1, 1]} : vector<32x32xf32> to vector<16x32xf32>
    %121 = math.exp %86 : vector<16x32xf32>
    %122 = math.exp %92 : vector<16x32xf32>
    %123 = arith.addf %121, %122 : vector<16x32xf32>
    %124 = tpu.reciprocal %123 {approx = true} : vector<16x32xf32> -> vector<16x32xf32>
    %125 = arith.mulf %121, %119 : vector<16x32xf32>
    %126 = arith.mulf %122, %120 : vector<16x32xf32>
    %127 = arith.addf %125, %126 : vector<16x32xf32>
    %128 = arith.mulf %127, %124 : vector<16x32xf32>
    %c1 = arith.constant 1 : index
    %c0_41 = arith.constant 0 : index
    %c0_42 = arith.constant 0 : index
    %129 = vector.load %arg4[%c1, %c0_41, %c0_42] : memref<3x1x32xf32, #tpu.memory_space<vmem>>, vector<1x1x32xf32>
    %130 = vector.shape_cast %129 : vector<1x1x32xf32> to vector<1x32xf32>
    %cst_43 = arith.constant dense<0.000000e+00> : vector<1x16xf32>
    %131 = tpu.matmul %130, %128, %cst_43 {dimension_numbers = #tpu.dot_dimension_numbers<[1], [1], [0], [0], [0, 0, 1, 0], [], []>} : vector<1x32xf32>, vector<16x32xf32>, vector<1x16xf32> -> vector<1x16xf32>
    %c1_44 = arith.constant 1 : index
    %c0_45 = arith.constant 0 : index
    %c0_46 = arith.constant 0 : index
    %132 = vector.load %arg3[%c1_44, %c0_45, %c0_46] : memref<3x32x33xf32, #tpu.memory_space<vmem>>, vector<1x32x33xf32>
    %133 = vector.shape_cast %132 : vector<1x32x33xf32> to vector<32x33xf32>
    %cst_47 = arith.constant dense<0.000000e+00> : vector<16x33xf32>
    %134 = tpu.matmul %128, %133, %cst_47 {dimension_numbers = #tpu.dot_dimension_numbers<[1], [0], [0], [1], [0, 0, 1, 1], [], []>} : vector<16x32xf32>, vector<32x33xf32>, vector<16x33xf32> -> vector<16x33xf32>
    %135 = vector.extract_strided_slice %134 {offsets = [0, 0], sizes = [16, 32], strides = [1, 1]} : vector<16x33xf32> to vector<16x32xf32>
    %136 = vector.extract_strided_slice %134 {offsets = [0, 32], sizes = [16, 1], strides = [1, 1]} : vector<16x33xf32> to vector<16x1xf32>
    %137 = vector.broadcast %136 : vector<16x1xf32> to vector<16x16xf32>
    %138 = vector.broadcast %131 : vector<1x16xf32> to vector<16x16xf32>
    %139 = arith.addf %137, %138 : vector<16x16xf32>
    %cst_48 = arith.constant 0.000000e+00 : f32
    %140 = vector.broadcast %cst_48 : f32 to vector<16x16xf32>
    %141 = arith.cmpf ogt, %139, %140 : vector<16x16xf32>
    %cst_49 = arith.constant 2.000000e-01 : f32
    %142 = vector.broadcast %cst_49 : f32 to vector<16x16xf32>
    %143 = arith.mulf %142, %139 : vector<16x16xf32>
    %144 = arith.select %141, %139, %143 : vector<16x16xi1>, vector<16x16xf32>
    %c1_50 = arith.constant 1 : index
    %c0_51 = arith.constant 0 : index
    %c0_52 = arith.constant 0 : index
    %145 = vector.load %arg5[%c1_50, %c0_51, %c0_52] : memref<3x1x32xf32, #tpu.memory_space<vmem>>, vector<1x1x32xf32>
    %146 = vector.shape_cast %145 : vector<1x1x32xf32> to vector<1x32xf32>
    %147 = vector.extract_strided_slice %0 {offsets = [0, 0, 0], sizes = [1, 16, 16], strides = [1, 1, 1]} : vector<3x16x16xf32> to vector<1x16x16xf32>
    %148 = vector.shape_cast %147 : vector<1x16x16xf32> to vector<16x16xf32>
    %149 = arith.addf %144, %148 : vector<16x16xf32>
    %cst_53 = arith.constant dense<0xFF800000> : vector<16xf32>
    %150 = vector.multi_reduction <maximumf>, %149, %cst_53 [1] : vector<16x16xf32> to vector<16xf32>
    %151 = vector.shape_cast %150 : vector<16xf32> to vector<16x1xf32>
    %152 = vector.broadcast %151 : vector<16x1xf32> to vector<16x16xf32>
    %153 = arith.subf %149, %152 : vector<16x16xf32>
    %154 = math.exp %153 : vector<16x16xf32>
    %cst_54 = arith.constant dense<0.000000e+00> : vector<16xf32>
    %155 = vector.multi_reduction <add>, %154, %cst_54 [1] : vector<16x16xf32> to vector<16xf32>
    %156 = vector.shape_cast %155 : vector<16xf32> to vector<16x1xf32>
    %157 = tpu.reciprocal %156 {approx = true} : vector<16x1xf32> -> vector<16x1xf32>
    %158 = vector.broadcast %157 : vector<16x1xf32> to vector<16x16xf32>
    %159 = arith.mulf %154, %158 : vector<16x16xf32>
    %cst_55 = arith.constant dense<0.000000e+00> : vector<16x32xf32>
    %160 = tpu.matmul %159, %135, %cst_55 {dimension_numbers = #tpu.dot_dimension_numbers<[1], [0], [0], [1], [0, 0, 1, 1], [], []>} : vector<16x16xf32>, vector<16x32xf32>, vector<16x32xf32> -> vector<16x32xf32>
    %161 = vector.broadcast %146 : vector<1x32xf32> to vector<16x32xf32>
    %162 = arith.addf %160, %161 : vector<16x32xf32>
    %163 = tpu.concatenate %162, %52, %68 in 1 : vector<16x32xf32>, vector<16x32xf32>, vector<16x32xf32> -> vector<16x96xf32>
    %c1_56 = arith.constant 1 : index
    %c0_57 = arith.constant 0 : index
    %c0_58 = arith.constant 0 : index
    %164 = vector.load %arg6[%c1_56, %c0_57, %c0_58] : memref<3x96x192xf32, #tpu.memory_space<vmem>>, vector<1x96x192xf32>
    %165 = vector.shape_cast %164 : vector<1x96x192xf32> to vector<96x192xf32>
    %cst_59 = arith.constant dense<0.000000e+00> : vector<16x192xf32>
    %166 = tpu.matmul %163, %165, %cst_59 {dimension_numbers = #tpu.dot_dimension_numbers<[1], [0], [0], [1], [0, 0, 1, 1], [], []>} : vector<16x96xf32>, vector<96x192xf32>, vector<16x192xf32> -> vector<16x192xf32>
    %c1_60 = arith.constant 1 : index
    %c0_61 = arith.constant 0 : index
    %c0_62 = arith.constant 0 : index
    %167 = vector.load %arg7[%c1_60, %c0_61, %c0_62] : memref<3x1x192xf32, #tpu.memory_space<vmem>>, vector<1x1x192xf32>
    %168 = vector.shape_cast %167 : vector<1x1x192xf32> to vector<1x192xf32>
    %169 = vector.broadcast %168 : vector<1x192xf32> to vector<16x192xf32>
    %170 = arith.addf %166, %169 : vector<16x192xf32>
    %171 = vector.extract_strided_slice %170 {offsets = [0, 0], sizes = [16, 32], strides = [1, 1]} : vector<16x192xf32> to vector<16x32xf32>
    %172 = vector.extract_strided_slice %170 {offsets = [0, 32], sizes = [16, 32], strides = [1, 1]} : vector<16x192xf32> to vector<16x32xf32>
    %173 = vector.extract_strided_slice %170 {offsets = [0, 64], sizes = [16, 32], strides = [1, 1]} : vector<16x192xf32> to vector<16x32xf32>
    %174 = vector.extract_strided_slice %170 {offsets = [0, 96], sizes = [16, 32], strides = [1, 1]} : vector<16x192xf32> to vector<16x32xf32>
    %175 = vector.extract_strided_slice %170 {offsets = [0, 128], sizes = [16, 32], strides = [1, 1]} : vector<16x192xf32> to vector<16x32xf32>
    %176 = arith.negf %175 : vector<16x32xf32>
    %177 = math.exp %176 : vector<16x32xf32>
    %cst_63 = arith.constant 1.000000e+00 : f32
    %178 = vector.broadcast %cst_63 : f32 to vector<16x32xf32>
    %179 = arith.addf %178, %177 : vector<16x32xf32>
    %180 = arith.divf %178, %179 : vector<16x32xf32>
    %181 = vector.extract_strided_slice %170 {offsets = [0, 160], sizes = [16, 32], strides = [1, 1]} : vector<16x192xf32> to vector<16x32xf32>
    %182 = arith.negf %181 : vector<16x32xf32>
    %183 = math.exp %182 : vector<16x32xf32>
    %cst_64 = arith.constant 1.000000e+00 : f32
    %184 = vector.broadcast %cst_64 : f32 to vector<16x32xf32>
    %185 = arith.addf %184, %183 : vector<16x32xf32>
    %186 = arith.divf %184, %185 : vector<16x32xf32>
    %187 = tpu.concatenate %172, %173 in 0 : vector<16x32xf32>, vector<16x32xf32> -> vector<32x32xf32>
    %cst_65 = arith.constant dense<0.000000e+00> : vector<16x32xf32>
    %188 = tpu.matmul %171, %187, %cst_65 {dimension_numbers = #tpu.dot_dimension_numbers<[1], [1], [0], [0], [0, 0, 1, 0], [], []>} : vector<16x32xf32>, vector<32x32xf32>, vector<16x32xf32> -> vector<16x32xf32>
    %189 = vector.extract_strided_slice %188 {offsets = [0, 0], sizes = [16, 16], strides = [1, 1]} : vector<16x32xf32> to vector<16x16xf32>
    %cst_66 = arith.constant dense<0xFF800000> : vector<16xf32>
    %190 = vector.multi_reduction <maximumf>, %189, %cst_66 [1] : vector<16x16xf32> to vector<16xf32>
    %191 = vector.shape_cast %190 : vector<16xf32> to vector<16x1xf32>
    %192 = vector.broadcast %191 : vector<16x1xf32> to vector<16x16xf32>
    %193 = arith.subf %189, %192 : vector<16x16xf32>
    %194 = math.exp %193 : vector<16x16xf32>
    %cst_67 = arith.constant dense<0.000000e+00> : vector<16xf32>
    %195 = vector.multi_reduction <add>, %194, %cst_67 [1] : vector<16x16xf32> to vector<16xf32>
    %196 = vector.shape_cast %195 : vector<16xf32> to vector<16x1xf32>
    %197 = tpu.reciprocal %196 {approx = true} : vector<16x1xf32> -> vector<16x1xf32>
    %198 = vector.broadcast %197 : vector<16x1xf32> to vector<16x16xf32>
    %199 = arith.mulf %194, %198 : vector<16x16xf32>
    %200 = vector.extract_strided_slice %188 {offsets = [0, 16], sizes = [16, 16], strides = [1, 1]} : vector<16x32xf32> to vector<16x16xf32>
    %cst_68 = arith.constant dense<0xFF800000> : vector<16xf32>
    %201 = vector.multi_reduction <maximumf>, %200, %cst_68 [1] : vector<16x16xf32> to vector<16xf32>
    %202 = vector.shape_cast %201 : vector<16xf32> to vector<16x1xf32>
    %203 = vector.broadcast %202 : vector<16x1xf32> to vector<16x16xf32>
    %204 = arith.subf %200, %203 : vector<16x16xf32>
    %205 = math.exp %204 : vector<16x16xf32>
    %cst_69 = arith.constant dense<0.000000e+00> : vector<16xf32>
    %206 = vector.multi_reduction <add>, %205, %cst_69 [1] : vector<16x16xf32> to vector<16xf32>
    %207 = vector.shape_cast %206 : vector<16xf32> to vector<16x1xf32>
    %208 = tpu.reciprocal %207 {approx = true} : vector<16x1xf32> -> vector<16x1xf32>
    %209 = vector.broadcast %208 : vector<16x1xf32> to vector<16x16xf32>
    %210 = arith.mulf %205, %209 : vector<16x16xf32>
    %211 = tpu.concatenate %199, %210 in 0 : vector<16x16xf32>, vector<16x16xf32> -> vector<32x16xf32>
    %cst_70 = arith.constant dense<0.000000e+00> : vector<32x32xf32>
    %212 = tpu.matmul %211, %174, %cst_70 {dimension_numbers = #tpu.dot_dimension_numbers<[1], [0], [0], [1], [0, 0, 1, 1], [], []>} : vector<32x16xf32>, vector<16x32xf32>, vector<32x32xf32> -> vector<32x32xf32>
    %213 = vector.extract_strided_slice %212 {offsets = [0, 0], sizes = [16, 32], strides = [1, 1]} : vector<32x32xf32> to vector<16x32xf32>
    %214 = vector.extract_strided_slice %212 {offsets = [16, 0], sizes = [16, 32], strides = [1, 1]} : vector<32x32xf32> to vector<16x32xf32>
    %215 = math.exp %180 : vector<16x32xf32>
    %216 = math.exp %186 : vector<16x32xf32>
    %217 = arith.addf %215, %216 : vector<16x32xf32>
    %218 = tpu.reciprocal %217 {approx = true} : vector<16x32xf32> -> vector<16x32xf32>
    %219 = arith.mulf %215, %213 : vector<16x32xf32>
    %220 = arith.mulf %216, %214 : vector<16x32xf32>
    %221 = arith.addf %219, %220 : vector<16x32xf32>
    %222 = arith.mulf %221, %218 : vector<16x32xf32>
    %c2 = arith.constant 2 : index
    %c0_71 = arith.constant 0 : index
    %c0_72 = arith.constant 0 : index
    %223 = vector.load %arg4[%c2, %c0_71, %c0_72] : memref<3x1x32xf32, #tpu.memory_space<vmem>>, vector<1x1x32xf32>
    %224 = vector.shape_cast %223 : vector<1x1x32xf32> to vector<1x32xf32>
    %cst_73 = arith.constant dense<0.000000e+00> : vector<1x16xf32>
    %225 = tpu.matmul %224, %222, %cst_73 {dimension_numbers = #tpu.dot_dimension_numbers<[1], [1], [0], [0], [0, 0, 1, 0], [], []>} : vector<1x32xf32>, vector<16x32xf32>, vector<1x16xf32> -> vector<1x16xf32>
    %c2_74 = arith.constant 2 : index
    %c0_75 = arith.constant 0 : index
    %c0_76 = arith.constant 0 : index
    %226 = vector.load %arg3[%c2_74, %c0_75, %c0_76] : memref<3x32x33xf32, #tpu.memory_space<vmem>>, vector<1x32x33xf32>
    %227 = vector.shape_cast %226 : vector<1x32x33xf32> to vector<32x33xf32>
    %cst_77 = arith.constant dense<0.000000e+00> : vector<16x33xf32>
    %228 = tpu.matmul %222, %227, %cst_77 {dimension_numbers = #tpu.dot_dimension_numbers<[1], [0], [0], [1], [0, 0, 1, 1], [], []>} : vector<16x32xf32>, vector<32x33xf32>, vector<16x33xf32> -> vector<16x33xf32>
    %229 = vector.extract_strided_slice %228 {offsets = [0, 0], sizes = [16, 32], strides = [1, 1]} : vector<16x33xf32> to vector<16x32xf32>
    %230 = vector.extract_strided_slice %228 {offsets = [0, 32], sizes = [16, 1], strides = [1, 1]} : vector<16x33xf32> to vector<16x1xf32>
    %231 = vector.broadcast %230 : vector<16x1xf32> to vector<16x16xf32>
    %232 = vector.broadcast %225 : vector<1x16xf32> to vector<16x16xf32>
    %233 = arith.addf %231, %232 : vector<16x16xf32>
    %cst_78 = arith.constant 0.000000e+00 : f32
    %234 = vector.broadcast %cst_78 : f32 to vector<16x16xf32>
    %235 = arith.cmpf ogt, %233, %234 : vector<16x16xf32>
    %cst_79 = arith.constant 2.000000e-01 : f32
    %236 = vector.broadcast %cst_79 : f32 to vector<16x16xf32>
    %237 = arith.mulf %236, %233 : vector<16x16xf32>
    %238 = arith.select %235, %233, %237 : vector<16x16xi1>, vector<16x16xf32>
    %c2_80 = arith.constant 2 : index
    %c0_81 = arith.constant 0 : index
    %c0_82 = arith.constant 0 : index
    %239 = vector.load %arg5[%c2_80, %c0_81, %c0_82] : memref<3x1x32xf32, #tpu.memory_space<vmem>>, vector<1x1x32xf32>
    %240 = vector.shape_cast %239 : vector<1x1x32xf32> to vector<1x32xf32>
    %241 = vector.extract_strided_slice %0 {offsets = [0, 0, 0], sizes = [1, 16, 16], strides = [1, 1, 1]} : vector<3x16x16xf32> to vector<1x16x16xf32>
    %242 = vector.shape_cast %241 : vector<1x16x16xf32> to vector<16x16xf32>
    %243 = arith.addf %238, %242 : vector<16x16xf32>
    %cst_83 = arith.constant dense<0xFF800000> : vector<16xf32>
    %244 = vector.multi_reduction <maximumf>, %243, %cst_83 [1] : vector<16x16xf32> to vector<16xf32>
    %245 = vector.shape_cast %244 : vector<16xf32> to vector<16x1xf32>
    %246 = vector.broadcast %245 : vector<16x1xf32> to vector<16x16xf32>
    %247 = arith.subf %243, %246 : vector<16x16xf32>
    %248 = math.exp %247 : vector<16x16xf32>
    %cst_84 = arith.constant dense<0.000000e+00> : vector<16xf32>
    %249 = vector.multi_reduction <add>, %248, %cst_84 [1] : vector<16x16xf32> to vector<16xf32>
    %250 = vector.shape_cast %249 : vector<16xf32> to vector<16x1xf32>
    %251 = tpu.reciprocal %250 {approx = true} : vector<16x1xf32> -> vector<16x1xf32>
    %252 = vector.broadcast %251 : vector<16x1xf32> to vector<16x16xf32>
    %253 = arith.mulf %248, %252 : vector<16x16xf32>
    %cst_85 = arith.constant dense<0.000000e+00> : vector<16x32xf32>
    %254 = tpu.matmul %253, %229, %cst_85 {dimension_numbers = #tpu.dot_dimension_numbers<[1], [0], [0], [1], [0, 0, 1, 1], [], []>} : vector<16x16xf32>, vector<16x32xf32>, vector<16x32xf32> -> vector<16x32xf32>
    %255 = vector.broadcast %240 : vector<1x32xf32> to vector<16x32xf32>
    %256 = arith.addf %254, %255 : vector<16x32xf32>
    %257 = tpu.concatenate %256, %52, %68 in 1 : vector<16x32xf32>, vector<16x32xf32>, vector<16x32xf32> -> vector<16x96xf32>
    %c2_86 = arith.constant 2 : index
    %c0_87 = arith.constant 0 : index
    %c0_88 = arith.constant 0 : index
    %258 = vector.load %arg6[%c2_86, %c0_87, %c0_88] : memref<3x96x192xf32, #tpu.memory_space<vmem>>, vector<1x96x192xf32>
    %259 = vector.shape_cast %258 : vector<1x96x192xf32> to vector<96x192xf32>
    %cst_89 = arith.constant dense<0.000000e+00> : vector<16x192xf32>
    %260 = tpu.matmul %257, %259, %cst_89 {dimension_numbers = #tpu.dot_dimension_numbers<[1], [0], [0], [1], [0, 0, 1, 1], [], []>} : vector<16x96xf32>, vector<96x192xf32>, vector<16x192xf32> -> vector<16x192xf32>
    %c2_90 = arith.constant 2 : index
    %c0_91 = arith.constant 0 : index
    %c0_92 = arith.constant 0 : index
    %261 = vector.load %arg7[%c2_90, %c0_91, %c0_92] : memref<3x1x192xf32, #tpu.memory_space<vmem>>, vector<1x1x192xf32>
    %262 = vector.shape_cast %261 : vector<1x1x192xf32> to vector<1x192xf32>
    %263 = vector.broadcast %262 : vector<1x192xf32> to vector<16x192xf32>
    %264 = arith.addf %260, %263 : vector<16x192xf32>
    %265 = vector.extract_strided_slice %264 {offsets = [0, 0], sizes = [16, 32], strides = [1, 1]} : vector<16x192xf32> to vector<16x32xf32>
    %266 = vector.extract_strided_slice %264 {offsets = [0, 32], sizes = [16, 32], strides = [1, 1]} : vector<16x192xf32> to vector<16x32xf32>
    %267 = vector.extract_strided_slice %264 {offsets = [0, 64], sizes = [16, 32], strides = [1, 1]} : vector<16x192xf32> to vector<16x32xf32>
    %268 = vector.extract_strided_slice %264 {offsets = [0, 96], sizes = [16, 32], strides = [1, 1]} : vector<16x192xf32> to vector<16x32xf32>
    %269 = vector.extract_strided_slice %264 {offsets = [0, 128], sizes = [16, 32], strides = [1, 1]} : vector<16x192xf32> to vector<16x32xf32>
    %270 = arith.negf %269 : vector<16x32xf32>
    %271 = math.exp %270 : vector<16x32xf32>
    %cst_93 = arith.constant 1.000000e+00 : f32
    %272 = vector.broadcast %cst_93 : f32 to vector<16x32xf32>
    %273 = arith.addf %272, %271 : vector<16x32xf32>
    %274 = arith.divf %272, %273 : vector<16x32xf32>
    %275 = vector.extract_strided_slice %264 {offsets = [0, 160], sizes = [16, 32], strides = [1, 1]} : vector<16x192xf32> to vector<16x32xf32>
    %276 = arith.negf %275 : vector<16x32xf32>
    %277 = math.exp %276 : vector<16x32xf32>
    %cst_94 = arith.constant 1.000000e+00 : f32
    %278 = vector.broadcast %cst_94 : f32 to vector<16x32xf32>
    %279 = arith.addf %278, %277 : vector<16x32xf32>
    %280 = arith.divf %278, %279 : vector<16x32xf32>
    %281 = tpu.concatenate %266, %267 in 0 : vector<16x32xf32>, vector<16x32xf32> -> vector<32x32xf32>
    %cst_95 = arith.constant dense<0.000000e+00> : vector<16x32xf32>
    %282 = tpu.matmul %265, %281, %cst_95 {dimension_numbers = #tpu.dot_dimension_numbers<[1], [1], [0], [0], [0, 0, 1, 0], [], []>} : vector<16x32xf32>, vector<32x32xf32>, vector<16x32xf32> -> vector<16x32xf32>
    %283 = vector.extract_strided_slice %282 {offsets = [0, 0], sizes = [16, 16], strides = [1, 1]} : vector<16x32xf32> to vector<16x16xf32>
    %cst_96 = arith.constant dense<0xFF800000> : vector<16xf32>
    %284 = vector.multi_reduction <maximumf>, %283, %cst_96 [1] : vector<16x16xf32> to vector<16xf32>
    %285 = vector.shape_cast %284 : vector<16xf32> to vector<16x1xf32>
    %286 = vector.broadcast %285 : vector<16x1xf32> to vector<16x16xf32>
    %287 = arith.subf %283, %286 : vector<16x16xf32>
    %288 = math.exp %287 : vector<16x16xf32>
    %cst_97 = arith.constant dense<0.000000e+00> : vector<16xf32>
    %289 = vector.multi_reduction <add>, %288, %cst_97 [1] : vector<16x16xf32> to vector<16xf32>
    %290 = vector.shape_cast %289 : vector<16xf32> to vector<16x1xf32>
    %291 = tpu.reciprocal %290 {approx = true} : vector<16x1xf32> -> vector<16x1xf32>
    %292 = vector.broadcast %291 : vector<16x1xf32> to vector<16x16xf32>
    %293 = arith.mulf %288, %292 : vector<16x16xf32>
    %294 = vector.extract_strided_slice %282 {offsets = [0, 16], sizes = [16, 16], strides = [1, 1]} : vector<16x32xf32> to vector<16x16xf32>
    %cst_98 = arith.constant dense<0xFF800000> : vector<16xf32>
    %295 = vector.multi_reduction <maximumf>, %294, %cst_98 [1] : vector<16x16xf32> to vector<16xf32>
    %296 = vector.shape_cast %295 : vector<16xf32> to vector<16x1xf32>
    %297 = vector.broadcast %296 : vector<16x1xf32> to vector<16x16xf32>
    %298 = arith.subf %294, %297 : vector<16x16xf32>
    %299 = math.exp %298 : vector<16x16xf32>
    %cst_99 = arith.constant dense<0.000000e+00> : vector<16xf32>
    %300 = vector.multi_reduction <add>, %299, %cst_99 [1] : vector<16x16xf32> to vector<16xf32>
    %301 = vector.shape_cast %300 : vector<16xf32> to vector<16x1xf32>
    %302 = tpu.reciprocal %301 {approx = true} : vector<16x1xf32> -> vector<16x1xf32>
    %303 = vector.broadcast %302 : vector<16x1xf32> to vector<16x16xf32>
    %304 = arith.mulf %299, %303 : vector<16x16xf32>
    %305 = tpu.concatenate %293, %304 in 0 : vector<16x16xf32>, vector<16x16xf32> -> vector<32x16xf32>
    %cst_100 = arith.constant dense<0.000000e+00> : vector<32x32xf32>
    %306 = tpu.matmul %305, %268, %cst_100 {dimension_numbers = #tpu.dot_dimension_numbers<[1], [0], [0], [1], [0, 0, 1, 1], [], []>} : vector<32x16xf32>, vector<16x32xf32>, vector<32x32xf32> -> vector<32x32xf32>
    %307 = vector.extract_strided_slice %306 {offsets = [0, 0], sizes = [16, 32], strides = [1, 1]} : vector<32x32xf32> to vector<16x32xf32>
    %308 = vector.extract_strided_slice %306 {offsets = [16, 0], sizes = [16, 32], strides = [1, 1]} : vector<32x32xf32> to vector<16x32xf32>
    %309 = math.exp %274 : vector<16x32xf32>
    %310 = math.exp %280 : vector<16x32xf32>
    %311 = arith.addf %309, %310 : vector<16x32xf32>
    %312 = tpu.reciprocal %311 {approx = true} : vector<16x32xf32> -> vector<16x32xf32>
    %313 = arith.mulf %309, %307 : vector<16x32xf32>
    %314 = arith.mulf %310, %308 : vector<16x32xf32>
    %315 = arith.addf %313, %314 : vector<16x32xf32>
    %316 = arith.mulf %315, %312 : vector<16x32xf32>
    %317 = tpu.concatenate %128, %222, %316 in 1 : vector<16x32xf32>, vector<16x32xf32>, vector<16x32xf32> -> vector<16x96xf32>
    %cst_101 = arith.constant 0.000000e+00 : f32
    %318 = vector.broadcast %cst_101 : f32 to vector<16x32xf32>
    %319 = tpu.concatenate %317, %318 in 1 : vector<16x96xf32>, vector<16x32xf32> -> vector<16x128xf32>
    %c0_102 = arith.constant 0 : index
    %c0_103 = arith.constant 0 : index
    %c0_104 = arith.constant 0 : index
    %320 = vector.load %arg8[%c0_102, %c0_103, %c0_104] : memref<1x16x128xf32, #tpu.memory_space<vmem>>, vector<1x16x128xf32>
    %321 = vector.shape_cast %320 : vector<1x16x128xf32> to vector<16x128xf32>
    %322 = vector.shape_cast %319 : vector<16x128xf32> to vector<1x16x128xf32>
    tpu.vector_store %arg8[%c0_102, %c0_103, %c0_104], %322 {strides = array<i32>} : memref<1x16x128xf32, #tpu.memory_space<vmem>>, vector<1x16x128xf32>,
    return
  }
  func.func @transform_0(%arg0: i32) -> (i32, i32, i32) {
    %c0_i32 = arith.constant 0 : i32
    %c0_i32_0 = arith.constant 0 : i32
    %c0_i32_1 = arith.constant 0 : i32
    return %arg0, %c0_i32, %c0_i32_0 : i32, i32, i32
  }
  func.func @transform_1(%arg0: i32) -> (i32, i32, i32) {
    %c0_i32 = arith.constant 0 : i32
    %c0_i32_0 = arith.constant 0 : i32
    %c0_i32_1 = arith.constant 0 : i32
    %c0_i32_2 = arith.constant 0 : i32
    return %c0_i32, %c0_i32_0, %c0_i32_1 : i32, i32, i32
  }
  func.func @transform_2(%arg0: i32) -> (i32, i32, i32) {
    %c0_i32 = arith.constant 0 : i32
    %c0_i32_0 = arith.constant 0 : i32
    %c0_i32_1 = arith.constant 0 : i32
    %c0_i32_2 = arith.constant 0 : i32
    return %c0_i32, %c0_i32_0, %c0_i32_1 : i32, i32, i32
  }
  func.func @transform_3(%arg0: i32) -> (i32, i32, i32) {
    %c0_i32 = arith.constant 0 : i32
    %c0_i32_0 = arith.constant 0 : i32
    %c0_i32_1 = arith.constant 0 : i32
    %c0_i32_2 = arith.constant 0 : i32
    return %c0_i32, %c0_i32_0, %c0_i32_1 : i32, i32, i32
  }
  func.func @transform_4(%arg0: i32) -> (i32, i32, i32) {
    %c0_i32 = arith.constant 0 : i32
    %c0_i32_0 = arith.constant 0 : i32
    %c0_i32_1 = arith.constant 0 : i32
    %c0_i32_2 = arith.constant 0 : i32
    return %c0_i32, %c0_i32_0, %c0_i32_1 : i32, i32, i32
  }
  func.func @transform_5(%arg0: i32) -> (i32, i32, i32) {
    %c0_i32 = arith.constant 0 : i32
    %c0_i32_0 = arith.constant 0 : i32
    %c0_i32_1 = arith.constant 0 : i32
    %c0_i32_2 = arith.constant 0 : i32
    return %c0_i32, %c0_i32_0, %c0_i32_1 : i32, i32, i32
  }
  func.func @transform_6(%arg0: i32) -> (i32, i32, i32) {
    %c0_i32 = arith.constant 0 : i32
    %c0_i32_0 = arith.constant 0 : i32
    %c0_i32_1 = arith.constant 0 : i32
    %c0_i32_2 = arith.constant 0 : i32
    return %c0_i32, %c0_i32_0, %c0_i32_1 : i32, i32, i32
  }
  func.func @transform_7(%arg0: i32) -> (i32, i32, i32) {
    %c0_i32 = arith.constant 0 : i32
    %c0_i32_0 = arith.constant 0 : i32
    %c0_i32_1 = arith.constant 0 : i32
    return %arg0, %c0_i32, %c0_i32_0 : i32, i32, i32
  }
}

</mosaic_0001>

<bundles_post_ra>
// kernel: msunit_forward.1
= control target key start
LH: loop header
LB: loop body
LE: loop exit
PB: predicated region body
PF: predicated region fallthrough
CT: control target
= control target key end

     0   :  { %12 = vsyncpa [#allocation3], 0  ;;  %s3138_s0 = inlined_call_operand.hbm [shape: f32[2,16,32], index: 0, kind: input, shape index: {}]   ;;  %s3139_s1 = inlined_call_operand.hbm [shape: f32[3,16,16], index: 1, kind: input, shape index: {}]   ;;  %s3140_s2 = inlined_call_operand.hbm [shape: f32[3,32,33], index: 2, kind: input, shape index: {}]   ;;  %s3141_s3 = inlined_call_operand.hbm [shape: f32[3,1,32], index: 3, kind: input, shape index: {}]   ;;  %s3142_s4 = inlined_call_operand.hbm [shape: f32[3,1,32], index: 4, kind: input, shape index: {}]   ;;  %s3143_s5 = inlined_call_operand.hbm [shape: f32[3,96,192], index: 5, kind: input, shape index: {}]   ;;  %s3144_s6 = inlined_call_operand.hbm [shape: f32[3,1,192], index: 6, kind: input, shape index: {}]   ;;  %s3145_s7 = inlined_call_operand.vmem [shape: f32[2,16,128], index: 7, kind: output, shape index: {}]  }
   0x1   :  { %14 = vsyncpa [#allocation3 + $0x1], 0 }
   0x2   :  { %15 = vsyncpa [#allocation5], 0 }
   0x3   :  { %16 = vsyncpa [#allocation8], 0 }
   0x4   :  { %17 = vsyncpa [#allocation11], 0  ;;  %s2712_s24 = smov 0   ;;  %s2714_s25 = smov 0  }
   0x5   :  { %s2716_s26 = smov 0   ;;  %s2718_s27 = smov 0  }
   0x6 LB: > { %s217_s30 = sshll.u32 %s3139_s1, 4  ;;  %s2736_s8 = sadd.s32 4294967295, %s2652_s27   ;;  %s2652_s27 = sphi %s2718_s27, %s3156_s27   ;;  %s2648_s26 = sphi %s2716_s26, %s3155_s26   ;;  %s2644_s25 = sphi %s2714_s25, %s3154_s25   ;;  %s2640_s24 = sphi %s2712_s24, %s3153_s24   ;;  %s218_s30 = int_to_ptr.hbm [resolvable:$true] %s217_s30 }
   0x7   : > { %p2027_p0 = scmp.ge.s32.totalorder %s2652_s27, 1  ;;  %p44_p1 = scmp.eq.s32.totalorder %s2736_s8, 0 }
   0x8   : > { %p206_p2 = scmp.lt.s32.totalorder %s2652_s27, 3  ;;  %s2654_s10 = smov [#allocation4]  }
   0x9   : > { %s219_s11 = sshll.u32 %s2654_s10, 4  ;;  %s245_s14 = sshll.u32 %s3141_s3, 4  ;;  %s220_s11 = int_to_ptr.vmem [resolvable:$true] %s219_s11  ;;  %s246_s14 = int_to_ptr.hbm [resolvable:$true] %s245_s14 }
   0xa   : > { %p2741_p3 = pnand %p2027_p0, %p206_p2  ;;  %s2655_s16 = smov [#allocation7]  }
   0xb   : > { %s247_s17 = sshll.u32 %s2655_s16, 4  ;;  %s3146_s18 = smov 128   ;;  %s248_s17 = int_to_ptr.vmem [resolvable:$true] %s247_s17 }
   0xc   : > { %p2151_p4 = pneg %p2741_p3  ;;  %s2657_s19 = smov 8  }
   0xd   : > { %s2658_s20 = smov 16   ;;  %s2659_s21 = smov 1  }
   0xe   : > { %p2752_p5 = pnand %p2151_p4, %p44_p1  ;;  %s273_s28 = sshll.u32 %s3143_s5, 4  ;;  %s274_s28 = int_to_ptr.hbm [resolvable:$true] %s273_s28 }
   0xf   : > { %s2660_s29 = smov [#allocation10]   ;;  %s2661_s12 = smov 256  }
  0x10   : > { %2154 = dma.hbm_to_vmem [thread:$0]  (!%p2752_p5), %s218_s30, 768, %s220_s11, [#allocation5], %s3146_s18, %s3146_s18, %s2657_s19  }
  0x11   : > { %2160 = dma.hbm_to_vmem [thread:$0]  (!%p2752_p5), %s246_s14, 48, %s248_s17, [#allocation8], %s2658_s20, %s2658_s20, %s2659_s21  }
  0x12   : > { %s275_s10 = sshll.u32 %s2660_s29, 4  ;;  %s231_s11 = sshll.u32 %s3140_s2, 4  ;;  %s276_s10 = int_to_ptr.vmem [resolvable:$true] %s275_s10  ;;  %s232_s11 = int_to_ptr.hbm [resolvable:$true] %s231_s11 }
  0x13   : > { %2166 = dma.hbm_to_vmem [thread:$0]  (!%p2752_p5), %s274_s28, 9216, %s276_s10, [#allocation11], %s2661_s12, %s2661_s12, %s2658_s20  }
  0x14   : > { %s2662_s16 = smov [#allocation6]   ;;  %s259_s22 = sshll.u32 %s3142_s4, 4  ;;  %s260_s22 = int_to_ptr.hbm [resolvable:$true] %s259_s22 }
  0x15   : > { %s233_s18 = sshll.u32 %s2662_s16, 4  ;;  %s3150_s23 = smov 128   ;;  %s234_s18 = int_to_ptr.vmem [resolvable:$true] %s233_s18 }
  0x16   : > { %2157 = dma.hbm_to_vmem [thread:$0]  (!%p2752_p5), %s232_s11, 1536, %s234_s18, [#allocation5], %s3150_s23, %s3150_s23, %s2657_s19  }
  0x17   : > { %s2663_s28 = smov [#allocation9]   ;;  %s287_s13 = sshll.u32 %s3144_s6, 4  ;;  %s288_s13 = int_to_ptr.hbm [resolvable:$true] %s287_s13 }
  0x18   : > { %s261_s29 = sshll.u32 %s2663_s28, 4  ;;  %s2664_s18 = smov [#allocation12]   ;;  %s262_s29 = int_to_ptr.vmem [resolvable:$true] %s261_s29 }
  0x19   : > { %2163 = dma.hbm_to_vmem [thread:$0]  (!%p2752_p5), %s260_s22, 48, %s262_s29, [#allocation8], %s2658_s20, %s2658_s20, %s2659_s21  }
  0x1a   : > { %s289_s30 = sshll.u32 %s2664_s18, 4  ;;  %s2665_s11 = smov 32   ;;  %s290_s30 = int_to_ptr.vmem [resolvable:$true] %s289_s30 }
  0x1b   : > { %s2666_s16 = smov 2   ;;  %s2787_s14 = sadd.s32 1, %s2652_s27  }
  0x1c   : > { %2169 = dma.hbm_to_vmem [thread:$0]  (!%p2752_p5), %s288_s13, 96, %s290_s30, [#allocation11], %s2665_s11, %s2665_s11, %s2666_s16  }
  0x1d   : > { %s27_s17 = ssub.s32 %s2652_s27, %s2787_s14  ;;  %s30_s28 = sadd.s32 1, %s2648_s26 }
  0x1e   : > { %p28_p6 = scmp.eq.s32.totalorder %s27_s17, 0  ;;  %p37_p7 = scmp.ne.s32.totalorder %s2648_s26, %s2644_s25 }
  0x1f   : > { %p38_p8 = scmp.eq.s32.totalorder %s2652_s27, 0  ;;  %p43_p9 = scmp.ne.s32.totalorder %s2644_s25, %s2640_s24 }
  0x20   : > { %s2798_s20 = scalar_select %p28_p6, %s2648_s26, %s30_s28  }
  0x21   : > { %p39_p10 = por %p38_p8, %p37_p7  ;;  %p2802_p11 = por %p44_p1, %p43_p9 }
  0x22   : > { %p2180_p12 = scmp.lt.s32.totalorder %s2652_s27, 2  ;;  %s303_s15 = sand.u32 1, %s2648_s26  }
  0x23   : > { %s2035_s22 = sshll.u32 %s303_s15, 4  ;;  %s2123_s29 = sshll.u32 %s2652_s27, 4 }
  0x24   : > { %s312_s13 = scalar_lea.hbm %s3138_s0, %s2123_s29  ;;  %s307_s18 = scalar_lea.vmem [#allocation2], %s2035_s22 }
  0x25   : > { %s315_s30 = sshll.u32 %s307_s18, 4  ;;  %s313_s11 = sshll.u32 %s312_s13, 4  ;;  %s316_s30 = int_to_ptr.vmem [resolvable:$true] %s315_s30  ;;  %s314_s11 = int_to_ptr.hbm [resolvable:$true] %s313_s11 }
  0x26   : > { %p2812_p13 = pnand %p2180_p12, %p39_p10  ;;  %s304_s16 = scalar_lea.sflag [#allocation3], %s303_s15 }
  0x27   : > { %s2576_s17 = sshra.s32 %s314_s11, 4  ;;  %s2583_s29 = scalar_lea.hbm %s3138_s0, 32  ;;  %s2577_s17 = int_to_ptr.hbm [resolvable:$true] %s2576_s17 }
  0x28   : > { %s2578_s28 = scalar_lea.hbm %s2577_s17, 16  ;;  %p2580_p2 = pneg %p2812_p13 }
  0x29   : > { %p2579_p0 = scmp.ne.s32.totalorder %s2577_s17, %s2578_s28  ;;  %p2584_p6 = scmp.lt.s32.totalorder %s2577_s17, %s3138_s0 }
  0x2a   : > { %p2585_p7 = scmp.lt.s32.totalorder %s2583_s29, %s2578_s28 }
  0x2b   : > { %p2581_p4 = pnand %p2580_p2, %p2579_p0 }
  0x2c   : > { %p2586_p8 = por %p2585_p7, %p2584_p6 }
  0x2d   : > { %p2582_p5 = pneg %p2581_p4 }
  0x2f   : > { %p2587_p9 = pnand %p2586_p8, %p2582_p5 }
  0x31   : > { %2590 = shalt.err (!%p2587_p9)
}
  0x32   : > { %2173 = dma.hbm_to_vmem [thread:$0]  (!%p2812_p13), %s314_s11, 256, %s316_s30, %s304_s16, %s3150_s23, %s3150_s23, %s2657_s19  }
  0x33   : > { %327 = sbr.rel (%p2741_p3) target bundleno = 6226 (0x1852), region = 48  ;;  %s329_s15 = sand.u32 (!%p2741_p3), 1, %s2644_s25  }
  0x34   : > { %s2039_s13 = sshll.u32 (!%p2741_p3), %s329_s15, 4  ;;  %s330_s18 = scalar_lea.sflag (!%p2741_p3), [#allocation3], %s329_s15 }
  0x35   : > { %s333_s27 = scalar_lea.vmem (!%p2741_p3), [#allocation2], %s2039_s13 }
  0x38   : > { %2623 = dma.done.wait (%p2802_p11), %s330_s18, 256  }
  0x39   : > { %2625 = vsyncadd (%p2802_p11), %s330_s18, 4294967040 }
  0x3a   : > { %2627 = dma.done.wait (%p44_p1), [#allocation5], 2304  }
  0x3b   : > { %2629 = vsyncadd (%p44_p1), [#allocation5], 4294964992 }
  0x3c   : > { %2631 = dma.done.wait (%p44_p1), [#allocation8], 96  }
  0x3d   : > { %2633 = vsyncadd (%p44_p1), [#allocation8], 4294967200 }
  0x3e   : > { %2635 = dma.done.wait (%p44_p1), [#allocation11], 9312  }
  0x3f   : > { %2637 = vsyncadd (%p44_p1), [#allocation11], 4294957984  ;;  %v2667_v0 = vmov 32   ;;  %v442_v1 = vld [vmem:[#allocation6 + $0x18] sm:$0xff]  ;;  %v441_v2 = vld [vmem:[#allocation6 + $0x10] sm:$0xff]  ;;  %vm409_vm0 = vcmask 261120  }
  0x40   : > { %2237 = vset.pattern.permute.xlu0 %v2667_v0  ;;  %2243 = vset.pattern.permute.xlu1 %v2667_v0  ;;  %v407_v3 = vld [vmem:[%s333_s27 + $0x8] sm:$0xff]  ;;  %v439_v5 = vld [vmem:[#allocation6] sm:$0xff]  ;;  %v2853_v16 = vld [vmem:[#allocation4] sm:$0xff]  ;;  %vm488_vm2 = vcmask 130048   ;;  %s2668_s9 = smov 32   ;;  %s2669_s19 = smov 64  }
  0x41   : > { %2244 = vset.pattern.permute.xlu2 %v2667_v0  ;;  %455 = vmatpush.msra.mxu1 %v442_v1  ;;  %v440_v4 = vld [vmem:[#allocation6 + $0x8] sm:$0xff]  ;;  %v406_v6 = vld [vmem:[%s333_s27] sm:$0xff]  ;;  %v405_v32 = vld [vmem:[#allocation4 + $0x28] sm:$0xff]  ;;  %vm667_vm4 = vcmask 523264   ;;  %vm700_vm5 = vcmask 785408   ;;  %s2670_s23 = smov 96  }
  0x42   : > { %2048 = vmatpush.xpose.msk.msra.mxu0 %vm409_vm0, %v407_v3  ;;  %v408_v7 = vld [vmem:[#allocation7] sm:$0x1]  ;;  %v404_v24 = vld [vmem:[#allocation4 + $0x20] sm:$0xff]  ;;  %v403_v26 = vld [vmem:[#allocation4 + $0x18] sm:$0xff]  ;;  %vm858_vm6 = vcmask 261248   ;;  %s2671_s21 = smov 112  }
  0x43   : > { %456 = vmatpush.msra.mxu1 %v441_v2  ;;  %v402_v15 = vld [vmem:[#allocation4 + $0x10] sm:$0xff]  ;;  %v2860_v33 = vld [vmem:[#allocation4 + $0x8] sm:$0xff]  ;;  %p395_p1 = scmp.lt.s32.totalorder %s2736_s8, 1 }
  0x45   : > { %457 = vmatpush.msra.mxu1 %v440_v4  ;;  %s3158_s8 = smov (!%p395_p1, %s2736_s8), 1 }
  0x46   : > { %2049 = vmatpush.xpose.msk.msra.mxu0 %vm409_vm0, %v406_v6  ;;  %s2124_s30 = sshll.u32 %s3158_s8, 4 }
  0x47   : > { %458 = vmatpush.msra.mxu1 %v439_v5  ;;  %s399_s16 = scalar_lea.vmem %s3145_s7, %s2124_s30 }
  0x48   : > { %2051 = vmatmul.msk.f32.vlgmr.msra.gmra.mxu1 %vm409_vm0, %v406_v6 }
  0x49   : > { %2050 = vmatmul.msk.f32.vlgmr.msra.gmra.mxu0 %vm409_vm0, %v408_v7 }
  0x50   : > { %2052 = vmatmul.msk.f32.gmra.mxu1 %vm409_vm0, %v407_v3 }
  0xc5   : > { %v460_v8 = vpop.f32.mrf.mxu1 }
  0xc6   : > { %468 = vperm.xlu0 %2237, %v460_v8   ;;  %v436_v10 = vpop.f32.mrf.mxu0 }
  0xc7   : > { %v476_v11 = vperm.slane %v436_v10, 0 }
  0xcd   : > { %v463_v9 = vpop.f32.mrf.mxu1 }
  0xce   : > { %473 = vperm.xlu0 %2237, %v463_v9   ;;  %534 = vmatpush.msra.mxu2 %v463_v9 }
  0xcf   : > { %587 = vmatpush.msra.mxu3 %v463_v9  ;;  %640 = vmatpush.msrb.mxu0 %v463_v9 }
  0xd0   : > { %535 = vmatpush.msra.mxu2 %v460_v8 }
  0xd1   : > { %588 = vmatpush.msra.mxu3 %v460_v8  ;;  %641 = vmatpush.msrb.mxu0 %v460_v8 }
 0x138   : > { %v469_v12 = vpop.permute.xlu0 %468 }
 0x139   : > { %v477_v13 = vadd.f32 %v476_v11, %v469_v12 }
 0x13b   : > { %vm479_vm1 = vcmp.gt.f32.partialorder %v477_v13, 0.0  ;;  %v481_v14 = vmul.f32 0.2, %v477_v13 }
 0x13d   : > { %v483_v17 = vsel %vm479_vm1, %v477_v13, %v481_v14 }
 0x13e   : > { %v543_v18 = vadd.f32 %v483_v17, %v402_v15  ;;  %v486_v19 = vadd.f32 %v483_v17, %v2853_v16  ;;  %v596_v27 = vadd.f32 %v483_v17, %v404_v24 }
 0x140   : > { %v474_v20 = vpop.permute.xlu0 %473  ;;  %v545_v21 = vsel %vm488_vm2, %v543_v18, -inf  ;;  %v489_v22 = vsel %vm488_vm2, %v486_v19, -inf  ;;  %v598_v31 = vsel %vm488_vm2, %v596_v27, -inf }
 0x141   : > { %v478_v23 = vadd.f32 %v476_v11, %v474_v20  ;;  %546 = vmax.xlane.f32.xlu1 %v545_v21  ;;  %490 = vmax.xlane.f32.xlu0 %v489_v22 }
 0x143   : > { %vm480_vm3 = vcmp.gt.f32.partialorder %v478_v23, 0.0  ;;  %v482_v25 = vmul.f32 0.2, %v478_v23 }
 0x145   : > { %v484_v28 = vsel %vm480_vm3, %v478_v23, %v482_v25  ;;  %v2877_v23 = vld [vmem:[#allocation9] ss:$0 sm:$0xff] }
 0x146   : > { %v544_v29 = vadd.f32 %v484_v28, %v403_v26  ;;  %v597_v34 = vadd.f32 %v484_v28, %v405_v32  ;;  %v487_v35 = vadd.f32 %v484_v28, %v2860_v33  ;;  %v692_v32 = vld [vmem:[#allocation10 + $0xb0] sm:$0xff] }
 0x147   : > { %711 = vmatpush.msrb.mxu2 %v692_v32 }
 0x148   : > { %v548_v30 = vsel %vm488_vm2, %v544_v29, -inf  ;;  %v601_v36 = vsel %vm488_vm2, %v597_v34, -inf  ;;  %v492_v37 = vsel %vm488_vm2, %v487_v35, -inf }
 0x149   : > { %549 = vmax.xlane.f32.xlu2 %v548_v30  ;;  %599 = vmax.xlane.f32.xlu1 %v598_v31 }
 0x151   : > { %602 = vmax.xlane.f32.xlu2 %v601_v36  ;;  %493 = vmax.xlane.f32.xlu1 %v492_v37  ;;  %v691_v36 = vld [vmem:[#allocation10 + $0xa8] sm:$0xff]  ;;  %v688_v37 = vld [vmem:[#allocation10 + $0x90] sm:$0xff] }
 0x1b4   : > { %v547_v38 = vpop.xlane.xlu1 %546  ;;  %v491_v41 = vpop.xlane.xlu0 %490 }
 0x1b5   : > { %v551_v39 = vsub.f32 %v543_v18, %v547_v38  ;;  %v495_v47 = vsub.f32 %v486_v19, %v491_v41  ;;  %v689_v38 = vld [vmem:[#allocation10 + $0x98] sm:$0xff]  ;;  %v684_v41 = vld [vmem:[#allocation10 + $0x70] sm:$0xff] }
 0x1b7   : > { %v553_v40 = vmul.f32 1.442695, %v551_v39  ;;  %v497_v51 = vmul.f32 1.442695, %v495_v47  ;;  %v686_v39 = vld [vmem:[#allocation10 + $0x80] sm:$0xff] }
 0x1b8   : > { %v678_v47 = vld [vmem:[#allocation10 + $0x40] sm:$0xff] }
 0x1b9   : > { %2258 = vpow2.f32 %v553_v40  ;;  %v687_v40 = vld [vmem:[#allocation10 + $0x88] sm:$0xff] }
 0x1bc   : > { %v550_v42 = vpop.xlane.xlu2 %549  ;;  %v600_v43 = vpop.xlane.xlu1 %599 }
 0x1bd   : > { %v552_v44 = vsub.f32 %v544_v29, %v550_v42  ;;  %v604_v45 = vsub.f32 %v596_v27, %v600_v43  ;;  %v685_v42 = vld [vmem:[#allocation10 + $0x78] sm:$0xff]  ;;  %v682_v43 = vld [vmem:[#allocation10 + $0x60] sm:$0xff] }
 0x1bf   : > { %v2259_v46 = vpop.eup %2258  ;;  %v555_v48 = vmul.f32 1.442695, %v552_v44  ;;  %v606_v49 = vmul.f32 1.442695, %v604_v45  ;;  %v683_v44 = vld [vmem:[#allocation10 + $0x68] sm:$0xff]  ;;  %v680_v45 = vld [vmem:[#allocation10 + $0x50] sm:$0xff] }
 0x1c0   : > { %v557_v50 = vsel %vm488_vm2, %v2259_v46, 0.0 }
 0x1c1   : > { %2260 = vpow2.f32 %v555_v48  ;;  %558 = vadd.xlane.f32.xlu2 %v557_v50  ;;  %v679_v48 = vld [vmem:[#allocation10 + $0x48] sm:$0xff]  ;;  %v677_v50 = vld [vmem:[#allocation10 + $0x38] sm:$0xff] }
 0x1c2   : > { %2262 = vpow2.f32 %v606_v49  ;;  %v676_v49 = vld [vmem:[#allocation10 + $0x30] sm:$0xff] }
 0x1c3   : > { %2264 = vpow2.f32 %v497_v51  ;;  %v674_v51 = vld [vmem:[#allocation10 + $0x20] sm:$0xff] }
 0x1c4   : > { %v603_v52 = vpop.xlane.xlu2 %602  ;;  %v494_v54 = vpop.xlane.xlu1 %493 }
 0x1c5   : > { %v605_v53 = vsub.f32 %v597_v34, %v603_v52  ;;  %v496_v58 = vsub.f32 %v487_v35, %v494_v54  ;;  %v693_v34 = vld [vmem:[#allocation10 + $0xb8] sm:$0xff]  ;;  %v690_v35 = vld [vmem:[#allocation10 + $0xa0] sm:$0xff]  ;;  %v675_v52 = vld [vmem:[#allocation10 + $0x28] sm:$0xff] }
 0x1c6   : > { %734 = vmatpush.msrb.mxu3 %v693_v34  ;;  %712 = vmatpush.msrb.mxu2 %v690_v35  ;;  %v673_v54 = vld [vmem:[#allocation10 + $0x18] sm:$0xff] }
 0x1c7   : > { %v2261_v55 = vpop.eup %2260  ;;  %v608_v56 = vmul.f32 1.442695, %v605_v53  ;;  %v499_v61 = vmul.f32 1.442695, %v496_v58  ;;  %v672_v53 = vld [vmem:[#allocation10 + $0x10] sm:$0xff] }
 0x1c8   : > { %v2263_v57 = vpop.eup %2262  ;;  %v560_v59 = vsel %vm488_vm2, %v2261_v55, 0.0  ;;  %735 = vmatpush.msrb.mxu3 %v691_v36  ;;  %713 = vmatpush.msrb.mxu2 %v688_v37 }
 0x1c9   : > { %2266 = vpow2.f32 %v608_v56  ;;  %561 = vadd.xlane.f32.xlu2 %v560_v59  ;;  %v610_v60 = vsel %vm488_vm2, %v2263_v57, 0.0  ;;  %v2265_v62 = vpop.eup %2264  ;;  %v671_v56 = vld [vmem:[#allocation10 + $0x8] sm:$0xff] }
 0x1ca   : > { %611 = vadd.xlane.f32.xlu1 %v610_v60  ;;  %2268 = vpow2.f32 %v499_v61  ;;  %v501_v1 = vsel %vm488_vm2, %v2265_v62, 0.0  ;;  %736 = vmatpush.msrb.mxu3 %v689_v38 }
 0x1cb   : > { %714 = vmatpush.msrb.mxu2 %v686_v39 }
 0x1cc   : > { %737 = vmatpush.msrb.mxu3 %v687_v40 }
 0x1cd   : > { %715 = vmatpush.msrb.mxu2 %v684_v41 }
 0x1ce   : > { %738 = vmatpush.msrb.mxu3 %v685_v42 }
 0x1cf   : > { %v2267_v63 = vpop.eup %2266  ;;  %716 = vmatpush.msrb.mxu2 %v682_v43 }
 0x1d0   : > { %v613_v0 = vsel %vm488_vm2, %v2267_v63, 0.0  ;;  %v2269_v2 = vpop.eup %2268  ;;  %739 = vmatpush.msrb.mxu3 %v683_v44 }
 0x1d1   : > { %502 = vadd.xlane.f32.xlu2 %v501_v1  ;;  %v504_v3 = vsel %vm488_vm2, %v2269_v2, 0.0  ;;  %717 = vmatpush.msrb.mxu2 %v680_v45 }
 0x1d2   : > { %614 = vadd.xlane.f32.xlu1 %v613_v0 }
 0x1d3   : > { %718 = vmatpush.msrb.mxu2 %v678_v47 }
 0x1d5   : > { %719 = vmatpush.msrb.mxu2 %v676_v49 }
 0x1d7   : > { %720 = vmatpush.msrb.mxu2 %v674_v51 }
 0x1d9   : > { %721 = vmatpush.msrb.mxu2 %v672_v53 }
 0x1da   : > { %505 = vadd.xlane.f32.xlu1 %v504_v3 }
 0x234   : > { %v559_v4 = vpop.xlane.xlu2 %558 }
 0x235   : > { %2270 = vrcp.f32 %v559_v4 }
 0x23b   : > { %v2271_v5 = vpop.eup %2270 }
 0x23c   : > { %v562_v6 = vpop.xlane.xlu2 %561  ;;  %v565_v7 = vmul.f32 %v2271_v5, %v2259_v46  ;;  %v681_v46 = vld [vmem:[#allocation10 + $0x58] sm:$0xff]  ;;  %v2909_v5 = vld [vmem:[#allocation12] sm:$0x3] }
 0x23d   : > { %2272 = vrcp.f32 %v562_v6  ;;  %v612_v8 = vpop.xlane.xlu1 %611  ;;  %740 = vmatpush.msrb.mxu3 %v681_v46  ;;  %v696_v6 = vperm.slane %v2909_v5, 0  ;;  %v697_v39 = vperm.slane %v2909_v5, 1 }
 0x23e   : > { %2274 = vrcp.f32 %v612_v8  ;;  %2055 = vmatmul.msk.f32.vlgmr.msra.gmra.mxu3 %vm488_vm2, %v565_v7 }
 0x23f   : > { %741 = vmatpush.msrb.mxu3 %v679_v48 }
 0x241   : > { %742 = vmatpush.msrb.mxu3 %v677_v50 }
 0x243   : > { %v2273_v9 = vpop.eup %2272  ;;  %743 = vmatpush.msrb.mxu3 %v675_v52 }
 0x244   : > { %v2275_v10 = vpop.eup %2274  ;;  %v503_v11 = vpop.xlane.xlu2 %502  ;;  %v566_v12 = vmul.f32 %v2273_v9, %v2261_v55  ;;  %v670_v55 = vld [vmem:[#allocation10] sm:$0xff] }
 0x245   : > { %v615_v13 = vpop.xlane.xlu1 %614  ;;  %2276 = vrcp.f32 %v503_v11  ;;  %v618_v14 = vmul.f32 %v2275_v10, %v2263_v57  ;;  %744 = vmatpush.msrb.mxu3 %v673_v54  ;;  %722 = vmatpush.msrb.mxu2 %v670_v55 }
 0x246   : > { %2278 = vrcp.f32 %v615_v13  ;;  %2056 = vmatmul.msk.f32.gmra.mxu3 %vm488_vm2, %v566_v12 }
 0x247   : > { %2057 = vmatmul.msk.f32.vlgmr.msrb.gmra.mxu0 %vm488_vm2, %v618_v14  ;;  %745 = vmatpush.msrb.mxu3 %v671_v56 }
 0x24b   : > { %v2277_v15 = vpop.eup %2276 }
 0x24c   : > { %v2279_v17 = vpop.eup %2278  ;;  %v509_v18 = vmul.f32 %v2277_v15, %v2265_v62 }
 0x24d   : > { %v506_v19 = vpop.xlane.xlu1 %505  ;;  %v619_v20 = vmul.f32 %v2279_v17, %v2267_v63 }
 0x24e   : > { %2280 = vrcp.f32 %v506_v19  ;;  %2053 = vmatmul.msk.f32.vlgmr.msra.gmra.mxu2 %vm488_vm2, %v509_v18 }
 0x24f   : > { %2058 = vmatmul.msk.f32.gmra.mxu0 %vm488_vm2, %v619_v20 }
 0x254   : > { %v2281_v21 = vpop.eup %2280 }
 0x255   : > { %v510_v22 = vmul.f32 %v2281_v21, %v2269_v2 }
 0x257   : > { %2054 = vmatmul.msk.f32.gmra.mxu2 %vm488_vm2, %v510_v22 }
 0x2c1   : > { %v590_v24 = vpop.f32.mrf.mxu3 }
 0x2c2   : > { %v591_v25 = vadd.f32 %v2877_v23, %v590_v24 }
 0x2c4   : > { %v643_v26 = vpop.f32.mrf.mxu0  ;;  %651 = vrot.lane.b32.xlu2 %v591_v25, %s2668_s9 }
 0x2c5   : > { %v644_v27 = vadd.f32 %v2877_v23, %v643_v26 }
 0x2c7   : > { %659 = vrot.lane.b32.xlu1 %v644_v27, %s2669_s19 }
 0x2c9   : > { %v593_v28 = vpop.f32.mrf.mxu3 }
 0x2ca   : > { %v594_v29 = vadd.f32 %v2877_v23, %v593_v28 }
 0x2cc   : > { %v646_v30 = vpop.f32.mrf.mxu0  ;;  %653 = vrot.lane.b32.xlu0 %v594_v29, %s2668_s9 }
 0x2cd   : > { %v647_v31 = vadd.f32 %v2877_v23, %v646_v30 }
 0x2cf   : > { %661 = vrot.lane.b32.xlu2 %v647_v31, %s2669_s19 }
 0x2d1   : > { %v537_v57 = vpop.f32.mrf.mxu2 }
 0x2d2   : > { %v538_v59 = vadd.f32 %v2877_v23, %v537_v57 }
 0x2da   : > { %v540_v62 = vpop.f32.mrf.mxu2 }
 0x2db   : > { %v541_v0 = vadd.f32 %v2877_v23, %v540_v62 }
 0x31e   : > { %v2887_v58 = vpop.permute.xlu2 %651 }
 0x31f   : > { %v665_v60 = vsel %vm409_vm0, %v538_v59, %v2887_v58 }
 0x329   : > { %v2901_v2 = vpop.permute.xlu2 %661 }
 0x339   : > { %v2892_v61 = vpop.permute.xlu1 %659 }
 0x33a   : > { %v668_v63 = vsel %vm667_vm4, %v665_v60, %v2892_v61 }
 0x33b   : > { %2059 = vmatmul.msk.f32.vlgmr.msrb.gmra.mxu2 %vm700_vm5, %v668_v63  ;;  %2061 = vmatmul.msk.f32.vlgmr.msrb.gmra.mxu3 %vm700_vm5, %v668_v63 }
 0x33e   : > { %v2899_v1 = vpop.permute.xlu0 %653 }
 0x33f   : > { %v666_v3 = vsel %vm409_vm0, %v541_v0, %v2899_v1 }
 0x340   : > { %v669_v4 = vsel %vm667_vm4, %v666_v3, %v2901_v2 }
 0x343   : > { %2060 = vmatmul.msk.f32.gmra.mxu2 %vm700_vm5, %v669_v4  ;;  %2062 = vmatmul.msk.f32.gmra.mxu3 %vm700_vm5, %v669_v4 }
 0x3be   : > { %v724_v7 = vpop.f32.mrf.mxu2  ;;  %v747_v40 = vpop.f32.mrf.mxu3 }
 0x3bf   : > { %v725_v8 = vadd.f32 %v724_v7, %v696_v6  ;;  %v748_v43 = vadd.f32 %v747_v40, %v697_v39 }
 0x3c1   : > { %793 = vrot.lane.b32.xlu1 %v725_v8, %s2670_s23  ;;  %v2063_v45 = vmul.f32 -1.442695, %v748_v43 }
 0x3c6   : > { %v727_v9 = vpop.f32.mrf.mxu2 }
 0x3c7   : > { %v728_v10 = vadd.f32 %v727_v9, %v696_v6 }
 0x3c9   : > { %795 = vrot.lane.b32.xlu2 %v728_v10, %s2670_s23  ;;  %v2238_v35 = vpack.i.bf16 %v725_v8, %v728_v10 }
 0x423   : > { %v796_v11 = vpop.permute.xlu2 %795 }
 0x424   : > { %799 = vrot.lane.b32.xlu0 %v796_v11, %s2670_s23 }
 0x433   : > { %v794_v12 = vpop.permute.xlu1 %793 }
 0x434   : > { %797 = vrot.lane.b32.xlu2 %v794_v12, %s2670_s23 }
 0x48e   : > { %v798_v14 = vpop.permute.xlu2 %797 }
 0x496   : > { %v800_v13 = vpop.permute.xlu0 %799 }
 0x497   : > { %2065 = vmatpush.xpose.msk.msrb.mxu1 %vm409_vm0, %v800_v13 }
 0x49b   : > { %2066 = vmatpush.xpose.msk.msrb.mxu1 %vm409_vm0, %v798_v14 }
 0x49f   : > { %2067 = vmatpush.xpose.msk.msrb.mxu1 %vm409_vm0, %v796_v11 }
 0x4a3   : > { %2068 = vmatpush.xpose.msk.msrb.mxu1 %vm409_vm0, %v794_v12 }
 0x4a6   : > { %2069 = vmatmul.msk.f32.vlgmr.msrb.gmra.mxu1 %vm409_vm0, %v725_v8 }
 0x4ae   : > { %2070 = vmatmul.msk.f32.gmra.mxu1 %vm409_vm0, %v728_v10 }
 0x523   : > { %v830_v15 = vpop.f32.mrf.mxu1 }
 0x524   : > { %v859_v17 = vsel %vm858_vm6, %v830_v15, -inf  ;;  %v836_v29 = vsel %vm488_vm2, %v830_v15, -inf }
 0x525   : > { %860 = vmax.xlane.f32.xlu1 %v859_v17 }
 0x52b   : > { %v833_v18 = vpop.f32.mrf.mxu1 }
 0x52c   : > { %v862_v19 = vsel %vm858_vm6, %v833_v18, -inf  ;;  %v839_v20 = vsel %vm488_vm2, %v833_v18, -inf }
 0x52d   : > { %863 = vmax.xlane.f32.xlu0 %v862_v19  ;;  %840 = vmax.xlane.f32.xlu1 %v839_v20 }
 0x598   : > { %v861_v21 = vpop.xlane.xlu1 %860 }
 0x599   : > { %v865_v22 = vsub.f32 %v830_v15, %v861_v21 }
 0x59b   : > { %v867_v23 = vmul.f32 1.442695, %v865_v22 }
 0x59d   : > { %2282 = vpow2.f32 %v867_v23  ;;  %v750_v23 = vpop.f32.mrf.mxu3 }
 0x5a0   : > { %v864_v24 = vpop.xlane.xlu0 %863  ;;  %v841_v36 = vpop.xlane.xlu1 %840 }
 0x5a1   : > { %v866_v25 = vsub.f32 %v833_v18, %v864_v24  ;;  %v843_v41 = vsub.f32 %v833_v18, %v841_v36  ;;  %v751_v24 = vadd.f32 %v750_v23, %v697_v39 }
 0x5a3   : > { %v2283_v26 = vpop.eup %2282  ;;  %v869_v27 = vmul.f32 1.442695, %v866_v25  ;;  %v846_v44 = vmul.f32 1.442695, %v843_v41  ;;  %v2064_v25 = vmul.f32 -1.442695, %v751_v24 }
 0x5a4   : > { %873 = vrot.lane.b32.xlu2 %v2283_v26, %s2671_s21 }
 0x5a5   : > { %2284 = vpow2.f32 %v869_v27 }
 0x5ab   : > { %v2285_v28 = vpop.eup %2284 }
 0x5ac   : > { %875 = vrot.lane.b32.xlu2 %v2285_v28, %s2671_s21 }
 0x5d5   : > { %837 = vmax.xlane.f32.xlu2 %v836_v29 }
 0x5fe   : > { %v874_v30 = vpop.permute.xlu2 %873 }
 0x5ff   : > { %v879_v31 = vsel %vm488_vm2, %v874_v30, 0.0 }
 0x600   : > { %880 = vadd.xlane.f32.xlu0 %v879_v31 }
 0x606   : > { %v876_v32 = vpop.permute.xlu2 %875 }
 0x607   : > { %v882_v34 = vsel %vm488_vm2, %v876_v32, 0.0 }
 0x608   : > { %883 = vadd.xlane.f32.xlu1 %v882_v34 }
 0x621   : > { %2239 = vrot.lane.b32.xlu1 %v2238_v35, %s2668_s9 }
 0x648   : > { %v838_v37 = vpop.xlane.xlu2 %837 }
 0x649   : > { %v842_v38 = vsub.f32 %v830_v15, %v838_v37 }
 0x64b   : > { %v844_v42 = vmul.f32 1.442695, %v842_v38 }
 0x64d   : > { %2286 = vpow2.f32 %v844_v42 }
 0x64e   : > { %2288 = vpow2.f32 %v846_v44  ;;  %v1015_v44 = vld [vmem:[#allocation6 + $0x38] sm:$0xff] }
 0x64f   : > { %2290 = vpow2.f32 %v2063_v45  ;;  %v1014_v45 = vld [vmem:[#allocation6 + $0x30] sm:$0xff]  ;;  %1028 = vmatpush.msra.mxu2 %v1015_v44 }
 0x650   : > { %v1134_v44 = vld [vmem:[#allocation10 + $0x128] sm:$0xff] }
 0x651   : > { %1029 = vmatpush.msra.mxu2 %v1014_v45  ;;  %v1131_v45 = vld [vmem:[#allocation10 + $0x110] sm:$0xff] }
 0x653   : > { %v2287_v46 = vpop.eup %2286 }
 0x654   : > { %v848_v47 = vsel %vm488_vm2, %v2287_v46, 0.0  ;;  %v2289_v48 = vpop.eup %2288 }
 0x655   : > { %849 = vadd.xlane.f32.xlu0 %v848_v47  ;;  %v2291_v49 = vpop.eup %2290  ;;  %v851_v50 = vsel %vm488_vm2, %v2289_v48, 0.0 }
 0x656   : > { %v759_v51 = vadd.f32 1.0, %v2291_v49 }
 0x658   : > { %2292 = vrcp.f32 %v759_v51  ;;  %v772_v59 = vand.u32 2147483648, %v759_v51  ;;  %vm766_vm8 = vweird.f32 %v759_v51  ;;  %v770_v62 = vand.u32 2147483647, %v759_v51 }
 0x65a   : > { %v773_v4 = vor.u32 1.1754944e-38, %v772_v59  ;;  %vm771_vm10 = vcmp.eq.f32.partialorder %v770_v62, 8.507059e+37 }
 0x65d   : > { %852 = vadd.xlane.f32.xlu0 %v851_v50 }
 0x65e   : > { %v2293_v52 = vpop.eup %2292 }
 0x65f   : > { %v762_v53 = vmul.f32 %v2293_v52, %v759_v51  ;;  %vm767_vm7 = vweird.f32 %v2293_v52  ;;  %v1012_v51 = vld [vmem:[#allocation6 + $0x20] sm:$0xff] }
 0x660   : > { %vm768_vm9 = vmor %vm766_vm8, %vm767_vm7 }
 0x661   : > { %v763_v54 = vsub.f32 1.0, %v762_v53 }
 0x663   : > { %v764_v56 = vmul.f32 %v2293_v52, %v763_v54 }
 0x665   : > { %v765_v57 = vadd.f32 %v2293_v52, %v764_v56 }
 0x667   : > { %v769_v3 = vsel %vm768_vm9, %v2293_v52, %v765_v57 }
 0x668   : > { %v774_v6 = vsel %vm771_vm10, %v773_v4, %v769_v3 }
 0x669   : > { %v940_v8 = vmul.f32 1.442695, %v774_v6 }
 0x673   : > { %v881_v55 = vpop.xlane.xlu0 %880 }
 0x674   : > { %2294 = vrcp.f32 %v881_v55 }
 0x67a   : > { %v2295_v60 = vpop.eup %2294 }
 0x67b   : > { %v884_v63 = vpop.xlane.xlu1 %883  ;;  %v887_v0 = vmul.f32 %v2295_v60, %v2283_v26 }
 0x67c   : > { %2296 = vrcp.f32 %v884_v63 }
 0x67d   : > { %891 = vrot.lane.b32.xlu2 %v887_v0, %s2671_s21  ;;  %2298 = vpow2.f32 %v940_v8 }
 0x682   : > { %v2297_v7 = vpop.eup %2296 }
 0x683   : > { %v888_v9 = vmul.f32 %v2297_v7, %v2285_v28  ;;  %v2938_v10 = vpop.eup %2298  ;;  %v981_v7 = vld [vmem:[#allocation7 + $0x1] sm:$0x1] }
 0x685   : > { %893 = vrot.lane.b32.xlu0 %v888_v9, %s2671_s21 }
 0x68d   : > { %946 = vrot.lane.b32.xlu0 %v2938_v10, %s2670_s23 }
 0x693   : > { %v2240_v11 = vpop.permute.xlu1 %2239 }
 0x694   : > { %v2241_v12 = vunpack.i.l.bf16 %v2240_v11  ;;  %v2242_v13 = vunpack.i.h.bf16 %v2240_v11 }
 0x696   : > { %925 = vmatpush.msra.mxu0 %v2241_v12 }
 0x698   : > { %926 = vmatpush.msra.mxu0 %v2242_v13 }
 0x6c8   : > { %v850_v14 = vpop.xlane.xlu0 %849 }
 0x6c9   : > { %2300 = vrcp.f32 %v850_v14 }
 0x6cf   : > { %v2301_v15 = vpop.eup %2300 }
 0x6d0   : > { %v856_v17 = vmul.f32 %v2301_v15, %v2287_v46  ;;  %v853_v18 = vpop.xlane.xlu0 %852  ;;  %v1013_v46 = vld [vmem:[#allocation6 + $0x28] sm:$0xff] }
 0x6d1   : > { %2302 = vrcp.f32 %v853_v18  ;;  %1030 = vmatpush.msra.mxu2 %v1013_v46  ;;  %v1132_v46 = vld [vmem:[#allocation10 + $0x118] sm:$0xff] }
 0x6d2   : > { %2071 = vmatmul.msk.f32.vlgmr.msra.gmra.mxu0 %vm488_vm2, %v856_v17  ;;  %2304 = vpow2.f32 %v2064_v25 }
 0x6d3   : > { %1031 = vmatpush.msra.mxu2 %v1012_v51  ;;  %v1128_v51 = vld [vmem:[#allocation10 + $0xf8] sm:$0xff] }
 0x6d7   : > { %v2303_v19 = vpop.eup %2302  ;;  %v892_v21 = vpop.permute.xlu2 %891 }
 0x6d8   : > { %v857_v20 = vmul.f32 %v2303_v19, %v2289_v48  ;;  %v2305_v26 = vpop.eup %2304 }
 0x6d9   : > { %v760_v28 = vadd.f32 1.0, %v2305_v26 }
 0x6da   : > { %2072 = vmatmul.msk.f32.gmra.mxu0 %vm488_vm2, %v857_v20 }
 0x6db   : > { %2306 = vrcp.f32 %v760_v28  ;;  %v787_v37 = vand.u32 2147483648, %v760_v28  ;;  %vm781_vm12 = vweird.f32 %v760_v28  ;;  %v785_v5 = vand.u32 2147483647, %v760_v28 }
 0x6dd   : > { %v788_v39 = vor.u32 1.1754944e-38, %v787_v37  ;;  %vm786_vm14 = vcmp.eq.f32.partialorder %v785_v5, 8.507059e+37  ;;  %v1142_v37 = vld [vmem:[#allocation10 + $0x168] sm:$0xff]  ;;  %v1139_v5 = vld [vmem:[#allocation10 + $0x150] sm:$0xff] }
 0x6e1   : > { %v2307_v30 = vpop.eup %2306 }
 0x6e2   : > { %2073 = vmatmul.msk.f32.gmra.mxu0 %vm488_vm2, %v892_v21  ;;  %v777_v31 = vmul.f32 %v2307_v30, %v760_v28  ;;  %vm782_vm11 = vweird.f32 %v2307_v30 }
 0x6e3   : > { %vm783_vm13 = vmor %vm781_vm12, %vm782_vm11 }
 0x6e4   : > { %v778_v34 = vsub.f32 1.0, %v777_v31 }
 0x6e6   : > { %v779_v35 = vmul.f32 %v2307_v30, %v778_v34 }
 0x6e8   : > { %v780_v36 = vadd.f32 %v2307_v30, %v779_v35  ;;  %v1141_v35 = vld [vmem:[#allocation10 + $0x160] sm:$0xff] }
 0x6ea   : > { %v784_v38 = vsel %vm783_vm13, %v2307_v30, %v780_v36  ;;  %v1144_v36 = vld [vmem:[#allocation10 + $0x178] sm:$0xff] }
 0x6eb   : > { %v789_v40 = vsel %vm786_vm14, %v788_v39, %v784_v38  ;;  %1185 = vmatpush.msra.mxu1 %v1144_v36  ;;  %v1140_v38 = vld [vmem:[#allocation10 + $0x158] sm:$0xff]  ;;  %v1137_v39 = vld [vmem:[#allocation10 + $0x140] sm:$0xff] }
 0x6ec   : > { %v942_v41 = vmul.f32 1.442695, %v789_v40  ;;  %v1138_v40 = vld [vmem:[#allocation10 + $0x148] sm:$0xff] }
 0x6ed   : > { %1186 = vmatpush.msra.mxu1 %v1142_v37 }
 0x6ee   : > { %2308 = vpow2.f32 %v942_v41  ;;  %v1135_v41 = vld [vmem:[#allocation10 + $0x130] sm:$0xff] }
 0x6ef   : > { %1187 = vmatpush.msra.mxu1 %v1140_v38 }
 0x6f1   : > { %1188 = vmatpush.msra.mxu1 %v1138_v40 }
 0x6f4   : > { %v2309_v43 = vpop.eup %2308 }
 0x6f7   : > { %v894_v22 = vpop.permute.xlu0 %893 }
 0x6f8   : > { %2074 = vmatmul.msk.f32.gmra.mxu0 %vm488_vm2, %v894_v22 }
 0x6ff   : > { %v947_v53 = vpop.permute.xlu0 %946 }
 0x700   : > { %v952_v55 = vadd.f32 %v2938_v10, %v947_v53 }
 0x74f   : > { %v928_v27 = vpop.f32.mrf.mxu0 }
 0x750   : > { %v956_v59 = vmul.f32 %v2938_v10, %v928_v27 }
 0x757   : > { %v931_v29 = vpop.f32.mrf.mxu0 }
 0x758   : > { %v957_v56 = vmul.f32 %v2309_v43, %v931_v29 }
 0x75f   : > { %v934_v32 = vpop.f32.mrf.mxu0 }
 0x760   : > { %960 = vrot.lane.b32.xlu1 %v934_v32, %s2668_s9 }
 0x775   : > { %v937_v42 = vpop.f32.mrf.mxu0 }
 0x776   : > { %962 = vrot.lane.b32.xlu2 %v937_v42, %s2668_s9  ;;  %v1136_v42 = vld [vmem:[#allocation10 + $0x138] sm:$0xff] }
 0x777   : > { %1189 = vmatpush.msra.mxu1 %v1136_v42 }
 0x779   : > { %1190 = vmatpush.msra.mxu1 %v1134_v44 }
 0x77b   : > { %1191 = vmatpush.msra.mxu1 %v1132_v46 }
 0x77e   : > { %948 = vrot.lane.b32.xlu2 %v2309_v43, %s2670_s23 }
 0x7d0   : > { %v963_v47 = vpop.permute.xlu2 %962 }
 0x7d1   : > { %v967_v48 = vmul.f32 %v2309_v43, %v963_v47  ;;  %v1129_v47 = vld [vmem:[#allocation10 + $0x100] sm:$0xff] }
 0x7d2   : > { %v961_v49 = vpop.permute.xlu1 %960 }
 0x7d3   : > { %v966_v50 = vmul.f32 %v2938_v10, %v961_v49  ;;  %972 = vrot.lane.b32.xlu0 %v967_v48, %s2670_s23  ;;  %v1130_v48 = vld [vmem:[#allocation10 + $0x108] sm:$0xff] }
 0x7d4   : > { %1192 = vmatpush.msra.mxu1 %v1130_v48 }
 0x7d5   : > { %970 = vrot.lane.b32.xlu1 %v966_v50, %s2670_s23  ;;  %v1127_v50 = vld [vmem:[#allocation10 + $0xf0] sm:$0xff] }
 0x7d6   : > { %1193 = vmatpush.msra.mxu1 %v1128_v51 }
 0x7d8   : > { %v949_v52 = vpop.permute.xlu2 %948 }
 0x7d9   : > { %v953_v54 = vadd.f32 %v2309_v43, %v949_v52  ;;  %v1133_v43 = vld [vmem:[#allocation10 + $0x120] sm:$0xff] }
 0x7da   : > { %v1125_v52 = vld [vmem:[#allocation10 + $0xe0] sm:$0xff] }
 0x7db   : > { %2310 = vrcp.f32 %v953_v54 }
 0x7dc   : > { %2312 = vrcp.f32 %v952_v55 }
 0x7e1   : > { %v2311_v62 = vpop.eup %2310 }
 0x7e2   : > { %v2313_v4 = vpop.eup %2312 }
 0x845   : > { %v973_v57 = vpop.permute.xlu0 %972 }
 0x846   : > { %v977_v60 = vadd.f32 %v973_v57, %v957_v56 }
 0x847   : > { %v971_v63 = vpop.permute.xlu1 %970 }
 0x848   : > { %v2956_v0 = vmul.f32 %v2311_v62, %v977_v60  ;;  %v976_v3 = vadd.f32 %v971_v63, %v956_v59  ;;  %v1126_v59 = vld [vmem:[#allocation10 + $0xe8] sm:$0xff]  ;;  %v1123_v60 = vld [vmem:[#allocation10 + $0xd0] sm:$0xff]  ;;  %v1124_v62 = vld [vmem:[#allocation10 + $0xd8] sm:$0xff] }
 0x849   : > { %1194 = vmatpush.msra.mxu1 %v1126_v59  ;;  %v1121_v63 = vld [vmem:[#allocation10 + $0xc0] sm:$0xff] }
 0x84a   : > { %v2958_v6 = vmul.f32 %v2313_v4, %v976_v3  ;;  %2075 = vmatpush.xpose.msk.msra.mxu3 %vm409_vm0, %v2956_v0  ;;  %v1122_v3 = vld [vmem:[#allocation10 + $0xc8] sm:$0xff]  ;;  %v2256_v4 = vld [vmem:[#allocation9 + $0x1] ss:$0 sm:$0xff] }
 0x84b   : > { %1195 = vmatpush.msra.mxu1 %v1124_v62 }
 0x84c   : > { %2078 = vmatmul.msk.f32.vlgmr.msra.gmra.mxu2 %vm409_vm0, %v2958_v6 }
 0x84d   : > { %1196 = vmatpush.msra.mxu1 %v1122_v3 }
 0x84e   : > { %2076 = vmatpush.xpose.msk.msra.mxu3 %vm409_vm0, %v2958_v6 }
 0x851   : > { %2077 = vmatmul.msk.f32.vlgmr.msra.gmra.mxu3 %vm409_vm0, %v981_v7 }
 0x854   : > { %2079 = vmatmul.msk.f32.gmra.mxu2 %vm409_vm0, %v2956_v0 }
 0x8cf   : > { %v1033_v8 = vpop.f32.mrf.mxu2 }
 0x8d0   : > { %1041 = vperm.xlu1 %2243, %v1033_v8  }
 0x8d4   : > { %v1008_v10 = vpop.f32.mrf.mxu3 }
 0x8d5   : > { %v1049_v11 = vperm.slane %v1008_v10, 0 }
 0x8d7   : > { %v1036_v9 = vpop.f32.mrf.mxu2 }
 0x8d8   : > { %1046 = vperm.xlu2 %2244, %v1036_v9   ;;  %1107 = vmatpush.msrb.mxu3 %v1036_v9 }
 0x8da   : > { %1108 = vmatpush.msrb.mxu3 %v1033_v8 }
 0x932   : > { %v1047_v12 = vpop.permute.xlu2 %1046 }
 0x933   : > { %v1051_v13 = vadd.f32 %v1049_v11, %v1047_v12 }
 0x935   : > { %vm1053_vm15 = vcmp.gt.f32.partialorder %v1051_v13, 0.0  ;;  %v1055_v14 = vmul.f32 0.2, %v1051_v13 }
 0x937   : > { %v1057_v15 = vsel %vm1053_vm15, %v1051_v13, %v1055_v14 }
 0x938   : > { %v1061_v17 = vadd.f32 %v1057_v15, %v2860_v33  ;;  %v2989_v15 = vld [vmem:[#allocation12 + $0x2] sm:$0x3] }
 0x93a   : > { %v1065_v18 = vsel %vm488_vm2, %v1061_v17, -inf }
 0x93b   : > { %1066 = vmax.xlane.f32.xlu1 %v1065_v18 }
 0x942   : > { %v1042_v19 = vpop.permute.xlu1 %1041 }
 0x943   : > { %v1050_v20 = vadd.f32 %v1049_v11, %v1042_v19 }
 0x945   : > { %vm1052_vm1 = vcmp.gt.f32.partialorder %v1050_v20, 0.0  ;;  %v1054_v21 = vmul.f32 0.2, %v1050_v20 }
 0x947   : > { %v1056_v22 = vsel %vm1052_vm1, %v1050_v20, %v1054_v21 }
 0x948   : > { %v1060_v23 = vadd.f32 %v1056_v22, %v2853_v16  ;;  %v1143_v16 = vld [vmem:[#allocation10 + $0x170] sm:$0xff] }
 0x949   : > { %1162 = vmatpush.msrb.mxu0 %v1143_v16 }
 0x94a   : > { %v1062_v24 = vsel %vm488_vm2, %v1060_v23, -inf }
 0x94b   : > { %1063 = vmax.xlane.f32.xlu0 %v1062_v24  ;;  %1163 = vmatpush.msrb.mxu0 %v1141_v35 }
 0x94d   : > { %1164 = vmatpush.msrb.mxu0 %v1139_v5 }
 0x94f   : > { %1165 = vmatpush.msrb.mxu0 %v1137_v39 }
 0x951   : > { %1166 = vmatpush.msrb.mxu0 %v1135_v41 }
 0x953   : > { %1167 = vmatpush.msrb.mxu0 %v1133_v43 }
 0x955   : > { %1168 = vmatpush.msrb.mxu0 %v1131_v45 }
 0x957   : > { %1169 = vmatpush.msrb.mxu0 %v1129_v47 }
 0x959   : > { %1170 = vmatpush.msrb.mxu0 %v1127_v50 }
 0x95b   : > { %1171 = vmatpush.msrb.mxu0 %v1125_v52  ;;  %v1149_v52 = vperm.slane %v2989_v15, 1 }
 0x95d   : > { %1172 = vmatpush.msrb.mxu0 %v1123_v60 }
 0x95f   : > { %1173 = vmatpush.msrb.mxu0 %v1121_v63 }
 0x9ae   : > { %v1067_v25 = vpop.xlane.xlu1 %1066 }
 0x9af   : > { %v1069_v26 = vsub.f32 %v1061_v17, %v1067_v25  ;;  %v1148_v17 = vperm.slane %v2989_v15, 0 }
 0x9b1   : > { %v1072_v27 = vmul.f32 1.442695, %v1069_v26 }
 0x9b3   : > { %2314 = vpow2.f32 %v1072_v27 }
 0x9b9   : > { %v2315_v28 = vpop.eup %2314 }
 0x9ba   : > { %v1077_v33 = vsel %vm488_vm2, %v2315_v28, 0.0 }
 0x9bb   : > { %1078 = vadd.xlane.f32.xlu0 %v1077_v33 }
 0x9be   : > { %v1064_v29 = vpop.xlane.xlu0 %1063 }
 0x9bf   : > { %v1068_v30 = vsub.f32 %v1060_v23, %v1064_v29 }
 0x9c1   : > { %v1070_v31 = vmul.f32 1.442695, %v1068_v30 }
 0x9c3   : > { %2316 = vpow2.f32 %v1070_v31 }
 0x9c9   : > { %v2317_v32 = vpop.eup %2316 }
 0x9ca   : > { %v1074_v34 = vsel %vm488_vm2, %v2317_v32, 0.0 }
 0x9cb   : > { %1075 = vadd.xlane.f32.xlu2 %v1074_v34 }
 0xa2e   : > { %v1079_v53 = vpop.xlane.xlu0 %1078 }
 0xa3e   : > { %v1076_v49 = vpop.xlane.xlu2 %1075 }
 0xa3f   : > { %2318 = vrcp.f32 %v1076_v49 }
 0xa40   : > { %2320 = vrcp.f32 %v1079_v53 }
 0xa45   : > { %v2319_v54 = vpop.eup %2318 }
 0xa46   : > { %v1082_v55 = vmul.f32 %v2319_v54, %v2317_v32  ;;  %v2321_v56 = vpop.eup %2320 }
 0xa47   : > { %v1083_v57 = vmul.f32 %v2321_v56, %v2315_v28 }
 0xa48   : > { %2080 = vmatmul.msk.f32.vlgmr.msrb.gmra.mxu3 %vm488_vm2, %v1082_v55 }
 0xa50   : > { %2081 = vmatmul.msk.f32.gmra.mxu3 %vm488_vm2, %v1083_v57 }
 0xacb   : > { %v1110_v7 = vpop.f32.mrf.mxu3 }
 0xacc   : > { %v1111_v8 = vadd.f32 %v2256_v4, %v1110_v7 }
 0xace   : > { %v1116_v9 = vsel %vm409_vm0, %v1111_v8, %v2887_v58 }
 0xacf   : > { %v1118_v10 = vsel %vm667_vm4, %v1116_v9, %v2892_v61 }
 0xad0   : > { %2082 = vmatmul.msk.f32.vlgmr.msrb.gmra.mxu0 %vm700_vm5, %v1118_v10  ;;  %2084 = vmatmul.msk.f32.vlgmr.msra.gmra.mxu1 %vm700_vm5, %v1118_v10 }
 0xad3   : > { %v1113_v11 = vpop.f32.mrf.mxu3 }
 0xad4   : > { %v1114_v12 = vadd.f32 %v2256_v4, %v1113_v11 }
 0xad6   : > { %v1117_v13 = vsel %vm409_vm0, %v1114_v12, %v2899_v1 }
 0xad7   : > { %v1119_v14 = vsel %vm667_vm4, %v1117_v13, %v2901_v2 }
 0xad8   : > { %2083 = vmatmul.msk.f32.gmra.mxu0 %vm700_vm5, %v1119_v14  ;;  %2085 = vmatmul.msk.f32.gmra.mxu1 %vm700_vm5, %v1119_v14 }
 0xb4d   : > { %v1175_v18 = vpop.f32.mrf.mxu0  ;;  %v1198_v53 = vpop.f32.mrf.mxu1 }
 0xb4e   : > { %v1176_v19 = vadd.f32 %v1175_v18, %v1148_v17  ;;  %v1199_v55 = vadd.f32 %v1198_v53, %v1149_v52  ;;  %v1465_v53 = vld [vmem:[#allocation6 + $0x58] sm:$0xff] }
 0xb4f   : > { %1478 = vmatpush.msra.mxu0 %v1465_v53  ;;  %v1587_v53 = vld [vmem:[#allocation10 + $0x200] sm:$0xff] }
 0xb50   : > { %1244 = vrot.lane.b32.xlu2 %v1176_v19, %s2670_s23  ;;  %v2086_v56 = vmul.f32 -1.442695, %v1199_v55 }
 0xb55   : > { %v1178_v20 = vpop.f32.mrf.mxu0 }
 0xb56   : > { %v1179_v21 = vadd.f32 %v1178_v20, %v1148_v17 }
 0xb58   : > { %1246 = vrot.lane.b32.xlu1 %v1179_v21, %s2670_s23  ;;  %v2245_v42 = vpack.i.bf16 %v1176_v19, %v1179_v21 }
 0xbaa   : > { %v1245_v22 = vpop.permute.xlu2 %1244 }
 0xbab   : > { %1248 = vrot.lane.b32.xlu1 %v1245_v22, %s2670_s23 }
 0xbca   : > { %v1247_v23 = vpop.permute.xlu1 %1246 }
 0xbcb   : > { %1250 = vrot.lane.b32.xlu0 %v1247_v23, %s2670_s23 }
 0xc1d   : > { %v1249_v25 = vpop.permute.xlu1 %1248 }
 0xc3d   : > { %v1251_v24 = vpop.permute.xlu0 %1250 }
 0xc3e   : > { %2088 = vmatpush.xpose.msk.msrb.mxu2 %vm409_vm0, %v1251_v24 }
 0xc42   : > { %2089 = vmatpush.xpose.msk.msrb.mxu2 %vm409_vm0, %v1249_v25 }
 0xc46   : > { %2090 = vmatpush.xpose.msk.msrb.mxu2 %vm409_vm0, %v1247_v23 }
 0xc4a   : > { %2091 = vmatpush.xpose.msk.msrb.mxu2 %vm409_vm0, %v1245_v22 }
 0xc4d   : > { %2092 = vmatmul.msk.f32.vlgmr.msrb.gmra.mxu2 %vm409_vm0, %v1176_v19 }
 0xc55   : > { %2093 = vmatmul.msk.f32.gmra.mxu2 %vm409_vm0, %v1179_v21 }
 0xcd0   : > { %v1281_v26 = vpop.f32.mrf.mxu2 }
 0xcd1   : > { %v1309_v27 = vsel %vm858_vm6, %v1281_v26, -inf  ;;  %v1287_v5 = vsel %vm488_vm2, %v1281_v26, -inf }
 0xcd2   : > { %1310 = vmax.xlane.f32.xlu0 %v1309_v27 }
 0xcd8   : > { %v1284_v28 = vpop.f32.mrf.mxu2 }
 0xcd9   : > { %v1312_v33 = vsel %vm858_vm6, %v1284_v28, -inf  ;;  %v1290_v29 = vsel %vm488_vm2, %v1284_v28, -inf }
 0xcda   : > { %1313 = vmax.xlane.f32.xlu2 %v1312_v33 }
 0xce2   : > { %1291 = vmax.xlane.f32.xlu2 %v1290_v29 }
 0xd45   : > { %v1311_v30 = vpop.xlane.xlu0 %1310 }
 0xd46   : > { %v1315_v31 = vsub.f32 %v1281_v26, %v1311_v30 }
 0xd48   : > { %v1317_v32 = vmul.f32 1.442695, %v1315_v31  ;;  %v1201_v31 = vpop.f32.mrf.mxu1 }
 0xd4a   : > { %2322 = vpow2.f32 %v1317_v32  ;;  %v1202_v32 = vadd.f32 %v1201_v31, %v1149_v52 }
 0xd4d   : > { %v1314_v34 = vpop.xlane.xlu2 %1313 }
 0xd4e   : > { %v1316_v16 = vsub.f32 %v1284_v28, %v1314_v34  ;;  %v2087_v34 = vmul.f32 -1.442695, %v1202_v32  ;;  %v2395_v32 = vld [vmem:[#allocation4 + $0x8] sm:$0xff] }
 0xd50   : > { %v2323_v35 = vpop.eup %2322  ;;  %v1319_v36 = vmul.f32 1.442695, %v1316_v16 }
 0xd51   : > { %1323 = vrot.lane.b32.xlu1 %v2323_v35, %s2671_s21 }
 0xd52   : > { %2324 = vpow2.f32 %v1319_v36 }
 0xd55   : > { %v1292_v43 = vpop.xlane.xlu2 %1291 }
 0xd56   : > { %v1294_v46 = vsub.f32 %v1284_v28, %v1292_v43 }
 0xd58   : > { %v2325_v37 = vpop.eup %2324  ;;  %v1297_v48 = vmul.f32 1.442695, %v1294_v46 }
 0xd59   : > { %1325 = vrot.lane.b32.xlu1 %v2325_v37, %s2671_s21 }
 0xd83   : > { %1288 = vmax.xlane.f32.xlu1 %v1287_v5 }
 0xdc3   : > { %v1324_v38 = vpop.permute.xlu1 %1323 }
 0xdc4   : > { %v1329_v39 = vsel %vm488_vm2, %v1324_v38, 0.0 }
 0xdc5   : > { %1330 = vadd.xlane.f32.xlu0 %v1329_v39 }
 0xdcb   : > { %v1326_v40 = vpop.permute.xlu1 %1325 }
 0xdcc   : > { %v1332_v41 = vsel %vm488_vm2, %v1326_v40, 0.0 }
 0xdcd   : > { %1333 = vadd.xlane.f32.xlu2 %v1332_v41 }
 0xde5   : > { %2246 = vrot.lane.b32.xlu2 %v2245_v42, %s2668_s9 }
 0xdf6   : > { %v1289_v44 = vpop.xlane.xlu1 %1288 }
 0xdf7   : > { %v1293_v45 = vsub.f32 %v1281_v26, %v1289_v44 }
 0xdf9   : > { %v1295_v47 = vmul.f32 1.442695, %v1293_v45 }
 0xdfb   : > { %2326 = vpow2.f32 %v1295_v47 }
 0xdfc   : > { %2328 = vpow2.f32 %v1297_v48 }
 0xdfd   : > { %2330 = vpow2.f32 %v2086_v56 }
 0xe01   : > { %v2327_v49 = vpop.eup %2326 }
 0xe02   : > { %v1299_v50 = vsel %vm488_vm2, %v2327_v49, 0.0  ;;  %v2329_v51 = vpop.eup %2328 }
 0xe03   : > { %1300 = vadd.xlane.f32.xlu0 %v1299_v50  ;;  %v1302_v54 = vsel %vm488_vm2, %v2329_v51, 0.0  ;;  %v2331_v57 = vpop.eup %2330 }
 0xe04   : > { %v1210_v59 = vadd.f32 1.0, %v2331_v57  ;;  %v1463_v57 = vld [vmem:[#allocation6 + $0x48] sm:$0xff] }
 0xe06   : > { %2332 = vrcp.f32 %v1210_v59  ;;  %v1223_v7 = vand.u32 2147483648, %v1210_v59  ;;  %vm1217_vm7 = vweird.f32 %v1210_v59  ;;  %v1221_v8 = vand.u32 2147483647, %v1210_v59 }
 0xe08   : > { %v1224_v11 = vor.u32 1.1754944e-38, %v1223_v7  ;;  %vm1222_vm9 = vcmp.eq.f32.partialorder %v1221_v8, 8.507059e+37 }
 0xe0b   : > { %1303 = vadd.xlane.f32.xlu0 %v1302_v54  ;;  %v1464_v54 = vld [vmem:[#allocation6 + $0x50] sm:$0xff] }
 0xe0c   : > { %v2333_v60 = vpop.eup %2332  ;;  %1479 = vmatpush.msra.mxu0 %v1464_v54  ;;  %v1588_v54 = vld [vmem:[#allocation10 + $0x208] sm:$0xff] }
 0xe0d   : > { %v1213_v62 = vmul.f32 %v2333_v60, %v1210_v59  ;;  %vm1218_vm3 = vweird.f32 %v2333_v60  ;;  %v1462_v59 = vld [vmem:[#allocation6 + $0x40] sm:$0xff] }
 0xe0e   : > { %vm1219_vm8 = vmor %vm1217_vm7, %vm1218_vm3  ;;  %1480 = vmatpush.msra.mxu0 %v1463_v57  ;;  %v1583_v57 = vld [vmem:[#allocation10 + $0x1e0] sm:$0xff] }
 0xe0f   : > { %v1214_v63 = vsub.f32 1.0, %v1213_v62 }
 0xe10   : > { %1481 = vmatpush.msra.mxu0 %v1462_v59  ;;  %v1584_v59 = vld [vmem:[#allocation10 + $0x1e8] sm:$0xff] }
 0xe11   : > { %v1215_v3 = vmul.f32 %v2333_v60, %v1214_v63 }
 0xe13   : > { %v1216_v4 = vadd.f32 %v2333_v60, %v1215_v3 }
 0xe15   : > { %v1220_v10 = vsel %vm1219_vm8, %v2333_v60, %v1216_v4 }
 0xe16   : > { %v1225_v12 = vsel %vm1222_vm9, %v1224_v11, %v1220_v10 }
 0xe17   : > { %v1390_v14 = vmul.f32 1.442695, %v1225_v12 }
 0xe38   : > { %v1331_v9 = vpop.xlane.xlu0 %1330 }
 0xe39   : > { %2334 = vrcp.f32 %v1331_v9 }
 0xe3f   : > { %v2335_v13 = vpop.eup %2334 }
 0xe40   : > { %v1334_v15 = vpop.xlane.xlu2 %1333  ;;  %v1337_v17 = vmul.f32 %v2335_v13, %v2323_v35 }
 0xe41   : > { %2336 = vrcp.f32 %v1334_v15 }
 0xe42   : > { %1341 = vrot.lane.b32.xlu1 %v1337_v17, %s2671_s21  ;;  %2338 = vpow2.f32 %v1390_v14  ;;  %v1431_v17 = vld [vmem:[#allocation7 + $0x2] sm:$0x1] }
 0xe47   : > { %v2337_v18 = vpop.eup %2336 }
 0xe48   : > { %v2247_v19 = vpop.permute.xlu2 %2246  ;;  %v1338_v20 = vmul.f32 %v2337_v18, %v2325_v37  ;;  %v3015_v21 = vpop.eup %2338 }
 0xe49   : > { %v2248_v22 = vunpack.i.l.bf16 %v2247_v19  ;;  %v2249_v23 = vunpack.i.h.bf16 %v2247_v19 }
 0xe4a   : > { %1396 = vrot.lane.b32.xlu1 %v3015_v21, %s2670_s23  ;;  %1343 = vrot.lane.b32.xlu0 %v1338_v20, %s2671_s21 }
 0xe4b   : > { %1375 = vmatpush.msra.mxu3 %v2248_v22 }
 0xe4d   : > { %1376 = vmatpush.msra.mxu3 %v2249_v23 }
 0xe76   : > { %v1301_v24 = vpop.xlane.xlu0 %1300 }
 0xe77   : > { %2340 = vrcp.f32 %v1301_v24 }
 0xe7d   : > { %v2341_v25 = vpop.eup %2340 }
 0xe7e   : > { %v1307_v26 = vmul.f32 %v2341_v25, %v2327_v49  ;;  %v1304_v27 = vpop.xlane.xlu0 %1303 }
 0xe7f   : > { %2342 = vrcp.f32 %v1304_v27 }
 0xe80   : > { %2094 = vmatmul.msk.f32.vlgmr.msra.gmra.mxu3 %vm488_vm2, %v1307_v26  ;;  %2344 = vpow2.f32 %v2087_v34  ;;  %v2394_v26 = vld [vmem:[#allocation4] sm:$0xff] }
 0xe85   : > { %v2343_v28 = vpop.eup %2342 }
 0xe86   : > { %v1308_v33 = vmul.f32 %v2343_v28, %v2329_v51  ;;  %v2345_v16 = vpop.eup %2344 }
 0xe87   : > { %v1211_v35 = vadd.f32 1.0, %v2345_v16 }
 0xe88   : > { %2095 = vmatmul.msk.f32.gmra.mxu3 %vm488_vm2, %v1308_v33 }
 0xe89   : > { %2346 = vrcp.f32 %v1211_v35  ;;  %v1238_v42 = vand.u32 2147483648, %v1211_v35  ;;  %vm1232_vm11 = vweird.f32 %v1211_v35  ;;  %v1236_v43 = vand.u32 2147483647, %v1211_v35 }
 0xe8b   : > { %v1239_v46 = vor.u32 1.1754944e-38, %v1238_v42  ;;  %vm1237_vm13 = vcmp.eq.f32.partialorder %v1236_v43, 8.507059e+37 }
 0xe8f   : > { %v2347_v36 = vpop.eup %2346 }
 0xe90   : > { %v1228_v5 = vmul.f32 %v2347_v36, %v1211_v35  ;;  %vm1233_vm10 = vweird.f32 %v2347_v36 }
 0xe91   : > { %vm1234_vm12 = vmor %vm1232_vm11, %vm1233_vm10 }
 0xe92   : > { %v1229_v38 = vsub.f32 1.0, %v1228_v5 }
 0xe94   : > { %v1230_v39 = vmul.f32 %v2347_v36, %v1229_v38 }
 0xe96   : > { %v1231_v41 = vadd.f32 %v2347_v36, %v1230_v39 }
 0xe98   : > { %v1235_v44 = vsel %vm1234_vm12, %v2347_v36, %v1231_v41 }
 0xe99   : > { %v1240_v47 = vsel %vm1237_vm13, %v1239_v46, %v1235_v44 }
 0xe9a   : > { %v1392_v48 = vmul.f32 1.442695, %v1240_v47  ;;  %v1593_v47 = vld [vmem:[#allocation10 + $0x230] sm:$0xff] }
 0xe9b   : > { %1612 = vmatpush.msrb.mxu3 %v1593_v47 }
 0xe9c   : > { %2348 = vpow2.f32 %v1392_v48  ;;  %v1594_v48 = vld [vmem:[#allocation10 + $0x238] sm:$0xff] }
 0xea2   : > { %v2349_v50 = vpop.eup %2348 }
 0xeb4   : > { %v1342_v29 = vpop.permute.xlu1 %1341 }
 0xeb5   : > { %2096 = vmatmul.msk.f32.gmra.mxu3 %vm488_vm2, %v1342_v29 }
 0xebc   : > { %v1344_v30 = vpop.permute.xlu0 %1343  ;;  %v1397_v60 = vpop.permute.xlu1 %1396 }
 0xebd   : > { %2097 = vmatmul.msk.f32.gmra.mxu3 %vm488_vm2, %v1344_v30  ;;  %v1402_v62 = vadd.f32 %v3015_v21, %v1397_v60  ;;  %v1581_v60 = vld [vmem:[#allocation10 + $0x1d0] sm:$0xff] }
 0xebf   : > { %2350 = vrcp.f32 %v1402_v62  ;;  %v1582_v62 = vld [vmem:[#allocation10 + $0x1d8] sm:$0xff] }
 0xec5   : > { %v2351_v7 = vpop.eup %2350 }
 0xf03   : > { %v1378_v37 = vpop.f32.mrf.mxu3 }
 0xf04   : > { %v1406_v63 = vmul.f32 %v3015_v21, %v1378_v37 }
 0xf0b   : > { %v1381_v40 = vpop.f32.mrf.mxu3 }
 0xf0c   : > { %v1407_v11 = vmul.f32 %v2349_v50, %v1381_v40 }
 0xf38   : > { %v1384_v45 = vpop.f32.mrf.mxu3 }
 0xf39   : > { %1410 = vrot.lane.b32.xlu2 %v1384_v45, %s2668_s9 }
 0xf40   : > { %v1387_v49 = vpop.f32.mrf.mxu3 }
 0xf41   : > { %1412 = vrot.lane.b32.xlu0 %v1387_v49, %s2668_s9  ;;  %v1591_v49 = vld [vmem:[#allocation10 + $0x220] sm:$0xff] }
 0xf42   : > { %1613 = vmatpush.msrb.mxu3 %v1591_v49 }
 0xf49   : > { %1398 = vrot.lane.b32.xlu0 %v2349_v50, %s2670_s23 }
 0xf93   : > { %v1411_v51 = vpop.permute.xlu2 %1410 }
 0xf94   : > { %v1416_v52 = vmul.f32 %v3015_v21, %v1411_v51  ;;  %v1589_v51 = vld [vmem:[#allocation10 + $0x210] sm:$0xff] }
 0xf95   : > { %1614 = vmatpush.msrb.mxu3 %v1589_v51 }
 0xf96   : > { %1420 = vrot.lane.b32.xlu2 %v1416_v52, %s2670_s23  ;;  %v1590_v52 = vld [vmem:[#allocation10 + $0x218] sm:$0xff] }
 0xf97   : > { %1615 = vmatpush.msrb.mxu3 %v1587_v53 }
 0xfb3   : > { %v1413_v55 = vpop.permute.xlu0 %1412 }
 0xfb4   : > { %v1417_v56 = vmul.f32 %v2349_v50, %v1413_v55  ;;  %v1585_v55 = vld [vmem:[#allocation10 + $0x1f0] sm:$0xff] }
 0xfb5   : > { %1616 = vmatpush.msrb.mxu3 %v1585_v55 }
 0xfb6   : > { %1422 = vrot.lane.b32.xlu1 %v1417_v56, %s2670_s23  ;;  %v1586_v56 = vld [vmem:[#allocation10 + $0x1f8] sm:$0xff] }
 0xfb7   : > { %1617 = vmatpush.msrb.mxu3 %v1583_v57 }
 0xfb9   : > { %1618 = vmatpush.msrb.mxu3 %v1581_v60 }
 0xfbb   : > { %v1399_v9 = vpop.permute.xlu0 %1398 }
 0xfbc   : > { %v1403_v10 = vadd.f32 %v2349_v50, %v1399_v9  ;;  %v1592_v50 = vld [vmem:[#allocation10 + $0x228] sm:$0xff] }
 0xfbe   : > { %2352 = vrcp.f32 %v1403_v10 }
 0xfc4   : > { %v2353_v14 = vpop.eup %2352 }
 0xff0   : > { %v1421_v3 = vpop.permute.xlu2 %1420 }
 0xff1   : > { %v1426_v4 = vadd.f32 %v1421_v3, %v1406_v63  ;;  %v1579_v63 = vld [vmem:[#allocation10 + $0x1c0] sm:$0xff]  ;;  %v1580_v3 = vld [vmem:[#allocation10 + $0x1c8] sm:$0xff] }
 0xff2   : > { %1619 = vmatpush.msrb.mxu3 %v1579_v63 }
 0xff3   : > { %v3032_v8 = vmul.f32 %v2351_v7, %v1426_v4  ;;  %v1577_v4 = vld [vmem:[#allocation10 + $0x1b0] sm:$0xff]  ;;  %v1578_v7 = vld [vmem:[#allocation10 + $0x1b8] sm:$0xff] }
 0xff4   : > { %1620 = vmatpush.msrb.mxu3 %v1577_v4 }
 0xff5   : > { %2101 = vmatmul.msk.f32.vlgmr.msra.gmra.mxu0 %vm409_vm0, %v3032_v8 }
0x1028   : > { %v1423_v12 = vpop.permute.xlu1 %1422 }
0x1029   : > { %v1427_v13 = vadd.f32 %v1423_v12, %v1407_v11  ;;  %v1575_v12 = vld [vmem:[#allocation10 + $0x1a0] sm:$0xff] }
0x102a   : > { %1621 = vmatpush.msrb.mxu3 %v1575_v12 }
0x102b   : > { %v3036_v15 = vmul.f32 %v2353_v14, %v1427_v13  ;;  %v1576_v13 = vld [vmem:[#allocation10 + $0x1a8] sm:$0xff]  ;;  %v1573_v14 = vld [vmem:[#allocation10 + $0x190] sm:$0xff] }
0x102c   : > { %1622 = vmatpush.msrb.mxu3 %v1573_v14 }
0x102d   : > { %2098 = vmatpush.xpose.msk.msra.mxu2 %vm409_vm0, %v3036_v15  ;;  %2102 = vmatmul.msk.f32.gmra.mxu0 %vm409_vm0, %v3036_v15 }
0x1031   : > { %2099 = vmatpush.xpose.msk.msra.mxu2 %vm409_vm0, %v3032_v8 }
0x1034   : > { %2100 = vmatmul.msk.f32.vlgmr.msra.gmra.mxu2 %vm409_vm0, %v1431_v17  ;;  %v1574_v17 = vld [vmem:[#allocation10 + $0x198] sm:$0xff] }
0x1035   : > { %1635 = vmatpush.msrb.mxu2 %v1594_v48 }
0x1037   : > { %1636 = vmatpush.msrb.mxu2 %v1592_v50 }
0x1039   : > { %1637 = vmatpush.msrb.mxu2 %v1590_v52 }
0x103b   : > { %1638 = vmatpush.msrb.mxu2 %v1588_v54 }
0x103d   : > { %1639 = vmatpush.msrb.mxu2 %v1586_v56 }
0x103f   : > { %1640 = vmatpush.msrb.mxu2 %v1584_v59 }
0x1041   : > { %1641 = vmatpush.msrb.mxu2 %v1582_v62 }
0x1043   : > { %1642 = vmatpush.msrb.mxu2 %v1580_v3 }
0x1045   : > { %1643 = vmatpush.msrb.mxu2 %v1578_v7 }
0x1047   : > { %1644 = vmatpush.msrb.mxu2 %v1576_v13 }
0x1049   : > { %1645 = vmatpush.msrb.mxu2 %v1574_v17 }
0x1072   : > { %v1483_v18 = vpop.f32.mrf.mxu0 }
0x1073   : > { %1491 = vperm.xlu2 %2244, %v1483_v18  }
0x10aa   : > { %v1486_v19 = vpop.f32.mrf.mxu0 }
0x10ab   : > { %1496 = vperm.xlu0 %2237, %v1486_v19   ;;  %1557 = vmatpush.msrb.mxu1 %v1486_v19  ;;  %v1572_v19 = vld [vmem:[#allocation10 + $0x188] sm:$0xff] }
0x10ac   : > { %1646 = vmatpush.msrb.mxu2 %v1572_v19 }
0x10ad   : > { %1558 = vmatpush.msrb.mxu1 %v1483_v18  ;;  %v1571_v18 = vld [vmem:[#allocation10 + $0x180] sm:$0xff] }
0x10ae   : > { %1623 = vmatpush.msrb.mxu3 %v1571_v18 }
0x10b7   : > { %v1458_v20 = vpop.f32.mrf.mxu2 }
0x10b8   : > { %v1499_v21 = vperm.slane %v1458_v20, 0  ;;  %v2257_v20 = vld [vmem:[#allocation9 + $0x2] ss:$0 sm:$0xff] }
0x10cd   : > { %v1492_v22 = vpop.permute.xlu2 %1491 }
0x10ce   : > { %v1500_v23 = vadd.f32 %v1499_v21, %v1492_v22 }
0x10d0   : > { %vm1502_vm14 = vcmp.gt.f32.partialorder %v1500_v23, 0.0  ;;  %v1504_v24 = vmul.f32 0.2, %v1500_v23 }
0x10d2   : > { %v1506_v25 = vsel %vm1502_vm14, %v1500_v23, %v1504_v24 }
0x10d3   : > { %v1510_v27 = vadd.f32 %v2394_v26, %v1506_v25 }
0x10d5   : > { %v1512_v28 = vsel %vm488_vm2, %v1510_v27, -inf }
0x10d6   : > { %1513 = vmax.xlane.f32.xlu1 %v1512_v28 }
0x111d   : > { %v1497_v33 = vpop.permute.xlu0 %1496 }
0x111e   : > { %v1501_v29 = vadd.f32 %v1499_v21, %v1497_v33 }
0x1120   : > { %vm1503_vm15 = vcmp.gt.f32.partialorder %v1501_v29, 0.0  ;;  %v1505_v30 = vmul.f32 0.2, %v1501_v29 }
0x1122   : > { %v1507_v31 = vsel %vm1503_vm15, %v1501_v29, %v1505_v30 }
0x1123   : > { %v1511_v34 = vadd.f32 %v2395_v32, %v1507_v31 }
0x1125   : > { %v1515_v16 = vsel %vm488_vm2, %v1511_v34, -inf }
0x1126   : > { %1516 = vmax.xlane.f32.xlu2 %v1515_v16 }
0x1149   : > { %v1514_v35 = vpop.xlane.xlu1 %1513 }
0x114a   : > { %v1518_v36 = vsub.f32 %v1510_v27, %v1514_v35 }
0x114c   : > { %v1520_v37 = vmul.f32 1.442695, %v1518_v36 }
0x114e   : > { %2354 = vpow2.f32 %v1520_v37 }
0x1154   : > { %v2355_v5 = vpop.eup %2354 }
0x1155   : > { %v1524_v38 = vsel %vm488_vm2, %v2355_v5, 0.0 }
0x1156   : > { %1525 = vadd.xlane.f32.xlu0 %v1524_v38 }
0x1199   : > { %v1517_v39 = vpop.xlane.xlu2 %1516 }
0x119a   : > { %v1519_v40 = vsub.f32 %v1511_v34, %v1517_v39 }
0x119c   : > { %v1522_v41 = vmul.f32 1.442695, %v1519_v40 }
0x119e   : > { %2356 = vpow2.f32 %v1522_v41 }
0x11a4   : > { %v2357_v42 = vpop.eup %2356 }
0x11a5   : > { %v1527_v43 = vsel %vm488_vm2, %v2357_v42, 0.0 }
0x11a6   : > { %1528 = vadd.xlane.f32.xlu1 %v1527_v43 }
0x11c9   : > { %v1526_v44 = vpop.xlane.xlu0 %1525 }
0x11ca   : > { %2358 = vrcp.f32 %v1526_v44 }
0x11d0   : > { %v2359_v45 = vpop.eup %2358 }
0x11d1   : > { %v1532_v46 = vmul.f32 %v2359_v45, %v2355_v5 }
0x11d3   : > { %2103 = vmatmul.msk.f32.vlgmr.msrb.gmra.mxu1 %vm488_vm2, %v1532_v46 }
0x1219   : > { %v1529_v9 = vpop.xlane.xlu1 %1528 }
0x121a   : > { %2360 = vrcp.f32 %v1529_v9 }
0x1220   : > { %v2361_v10 = vpop.eup %2360 }
0x1221   : > { %v1533_v11 = vmul.f32 %v2361_v10, %v2357_v42 }
0x1223   : > { %2104 = vmatmul.msk.f32.gmra.mxu1 %vm488_vm2, %v1533_v11 }
0x1250   : > { %v1560_v21 = vpop.f32.mrf.mxu1 }
0x1251   : > { %v1561_v22 = vadd.f32 %v2257_v20, %v1560_v21 }
0x1253   : > { %v1566_v23 = vsel %vm409_vm0, %v1561_v22, %v2887_v58  ;;  %v3063_v58 = vld [vmem:[#allocation12 + $0x4] sm:$0x3] }
0x1254   : > { %v1568_v24 = vsel %vm667_vm4, %v1566_v23, %v2892_v61  ;;  %v1598_v61 = vperm.slane %v3063_v58, 0  ;;  %v1599_v63 = vperm.slane %v3063_v58, 1 }
0x1255   : > { %2105 = vmatmul.msk.f32.vlgmr.msrb.gmra.mxu3 %vm700_vm5, %v1568_v24  ;;  %2107 = vmatmul.msk.f32.vlgmr.msrb.gmra.mxu2 %vm700_vm5, %v1568_v24 }
0x12a0   : > { %v1563_v25 = vpop.f32.mrf.mxu1 }
0x12a1   : > { %v1564_v26 = vadd.f32 %v2257_v20, %v1563_v25 }
0x12a3   : > { %v1567_v27 = vsel %vm409_vm0, %v1564_v26, %v2899_v1 }
0x12a4   : > { %v1569_v28 = vsel %vm667_vm4, %v1567_v27, %v2901_v2 }
0x12a5   : > { %2106 = vmatmul.msk.f32.gmra.mxu3 %vm700_vm5, %v1569_v28  ;;  %2108 = vmatmul.msk.f32.gmra.mxu2 %vm700_vm5, %v1569_v28 }
0x12d8   : > { %v1625_v33 = vpop.f32.mrf.mxu3  ;;  %v1648_v3 = vpop.f32.mrf.mxu2 }
0x12d9   : > { %v1626_v29 = vadd.f32 %v1625_v33, %v1598_v61  ;;  %v1649_v7 = vadd.f32 %v1648_v3, %v1599_v63 }
0x12db   : > { %1694 = vrot.lane.b32.xlu0 %v1626_v29, %s2670_s23  ;;  %v2109_v9 = vmul.f32 -1.442695, %v1649_v7 }
0x1328   : > { %v1628_v30 = vpop.f32.mrf.mxu3 }
0x1329   : > { %v1629_v31 = vadd.f32 %v1628_v30, %v1598_v61 }
0x132b   : > { %1696 = vrot.lane.b32.xlu2 %v1629_v31, %s2670_s23  ;;  %v2250_v51 = vpack.i.bf16 %v1626_v29, %v1629_v31 }
0x134d   : > { %v1695_v1 = vpop.permute.xlu0 %1694 }
0x134e   : > { %1698 = vrot.lane.b32.xlu2 %v1695_v1, %s2670_s23 }
0x1385   : > { %v1697_v2 = vpop.permute.xlu2 %1696 }
0x1386   : > { %1700 = vrot.lane.b32.xlu1 %v1697_v2, %s2670_s23 }
0x13a8   : > { %v1699_v34 = vpop.permute.xlu2 %1698 }
0x13f8   : > { %v1701_v32 = vpop.permute.xlu1 %1700 }
0x13f9   : > { %2111 = vmatpush.xpose.msk.msrb.mxu0 %vm409_vm0, %v1701_v32 }
0x13fd   : > { %2112 = vmatpush.xpose.msk.msrb.mxu0 %vm409_vm0, %v1699_v34 }
0x1401   : > { %2113 = vmatpush.xpose.msk.msrb.mxu0 %vm409_vm0, %v1697_v2 }
0x1405   : > { %2114 = vmatpush.xpose.msk.msrb.mxu0 %vm409_vm0, %v1695_v1 }
0x1408   : > { %2115 = vmatmul.msk.f32.vlgmr.msrb.gmra.mxu0 %vm409_vm0, %v1626_v29 }
0x1410   : > { %2116 = vmatmul.msk.f32.gmra.mxu0 %vm409_vm0, %v1629_v31 }
0x1485   : > { %v1731_v16 = vpop.f32.mrf.mxu0 }
0x1486   : > { %v1759_v35 = vsel %vm858_vm6, %v1731_v16, -inf  ;;  %v1737_v46 = vsel %vm488_vm2, %v1731_v16, -inf }
0x1487   : > { %1760 = vmax.xlane.f32.xlu0 %v1759_v35 }
0x148d   : > { %v1734_v36 = vpop.f32.mrf.mxu0 }
0x148e   : > { %v1762_v37 = vsel %vm858_vm6, %v1734_v36, -inf  ;;  %v1740_v5 = vsel %vm488_vm2, %v1734_v36, -inf }
0x148f   : > { %1763 = vmax.xlane.f32.xlu2 %v1762_v37  ;;  %1741 = vmax.xlane.f32.xlu0 %v1740_v5  ;;  %v1651_v5 = vpop.f32.mrf.mxu2 }
0x14fa   : > { %v1761_v38 = vpop.xlane.xlu0 %1760 }
0x14fb   : > { %v1765_v39 = vsub.f32 %v1731_v16, %v1761_v38  ;;  %v1652_v38 = vadd.f32 %v1651_v5, %v1599_v63 }
0x14fd   : > { %v1767_v40 = vmul.f32 1.442695, %v1765_v39  ;;  %v2110_v39 = vmul.f32 -1.442695, %v1652_v38 }
0x14ff   : > { %2362 = vpow2.f32 %v1767_v40 }
0x1502   : > { %v1764_v41 = vpop.xlane.xlu2 %1763  ;;  %v1742_v52 = vpop.xlane.xlu0 %1741 }
0x1503   : > { %v1766_v42 = vsub.f32 %v1734_v36, %v1764_v41  ;;  %v1744_v55 = vsub.f32 %v1734_v36, %v1742_v52 }
0x1505   : > { %v2363_v43 = vpop.eup %2362  ;;  %v1769_v44 = vmul.f32 1.442695, %v1766_v42  ;;  %v1747_v57 = vmul.f32 1.442695, %v1744_v55 }
0x1506   : > { %1773 = vrot.lane.b32.xlu1 %v2363_v43, %s2671_s21 }
0x1507   : > { %2364 = vpow2.f32 %v1769_v44 }
0x150d   : > { %v2365_v45 = vpop.eup %2364 }
0x150e   : > { %1775 = vrot.lane.b32.xlu1 %v2365_v45, %s2671_s21 }
0x1538   : > { %1738 = vmax.xlane.f32.xlu1 %v1737_v46 }
0x1578   : > { %v1774_v47 = vpop.permute.xlu1 %1773 }
0x1579   : > { %v1779_v48 = vsel %vm488_vm2, %v1774_v47, 0.0 }
0x157a   : > { %1780 = vadd.xlane.f32.xlu2 %v1779_v48 }
0x1580   : > { %v1776_v49 = vpop.permute.xlu1 %1775 }
0x1581   : > { %v1782_v50 = vsel %vm488_vm2, %v1776_v49, 0.0 }
0x1582   : > { %1783 = vadd.xlane.f32.xlu0 %v1782_v50 }
0x1596   : > { %2251 = vrot.lane.b32.xlu0 %v2250_v51, %s2668_s9 }
0x15ab   : > { %v1739_v53 = vpop.xlane.xlu1 %1738 }
0x15ac   : > { %v1743_v54 = vsub.f32 %v1731_v16, %v1739_v53 }
0x15ae   : > { %v1745_v56 = vmul.f32 1.442695, %v1743_v54 }
0x15b0   : > { %2366 = vpow2.f32 %v1745_v56 }
0x15b1   : > { %2368 = vpow2.f32 %v1747_v57 }
0x15b2   : > { %2370 = vpow2.f32 %v2109_v9 }
0x15b6   : > { %v2367_v59 = vpop.eup %2366 }
0x15b7   : > { %v1749_v60 = vsel %vm488_vm2, %v2367_v59, 0.0  ;;  %v2369_v62 = vpop.eup %2368 }
0x15b8   : > { %1750 = vadd.xlane.f32.xlu2 %v1749_v60  ;;  %v1752_v4 = vsel %vm488_vm2, %v2369_v62, 0.0  ;;  %v2371_v10 = vpop.eup %2370 }
0x15b9   : > { %v1660_v11 = vadd.f32 1.0, %v2371_v10 }
0x15bb   : > { %2372 = vrcp.f32 %v1660_v11  ;;  %v1673_v19 = vand.u32 2147483648, %v1660_v11  ;;  %vm1667_vm1 = vweird.f32 %v1660_v11  ;;  %v1671_v20 = vand.u32 2147483647, %v1660_v11 }
0x15bd   : > { %v1674_v23 = vor.u32 1.1754944e-38, %v1673_v19  ;;  %vm1672_vm7 = vcmp.eq.f32.partialorder %v1671_v20, 8.507059e+37 }
0x15c0   : > { %1753 = vadd.xlane.f32.xlu2 %v1752_v4 }
0x15c1   : > { %v2373_v12 = vpop.eup %2372 }
0x15c2   : > { %v1663_v13 = vmul.f32 %v2373_v12, %v1660_v11  ;;  %vm1668_vm6 = vweird.f32 %v2373_v12 }
0x15c3   : > { %vm1669_vm3 = vmor %vm1667_vm1, %vm1668_vm6 }
0x15c4   : > { %v1664_v14 = vsub.f32 1.0, %v1663_v13 }
0x15c6   : > { %v1665_v17 = vmul.f32 %v2373_v12, %v1664_v14 }
0x15c8   : > { %v1666_v18 = vadd.f32 %v2373_v12, %v1665_v17 }
0x15ca   : > { %v1670_v22 = vsel %vm1669_vm3, %v2373_v12, %v1666_v18 }
0x15cb   : > { %v1675_v24 = vsel %vm1672_vm7, %v1674_v23, %v1670_v22 }
0x15cc   : > { %v1840_v26 = vmul.f32 1.442695, %v1675_v24 }
0x15ed   : > { %v1781_v21 = vpop.xlane.xlu2 %1780 }
0x15ee   : > { %2374 = vrcp.f32 %v1781_v21 }
0x15f4   : > { %v2375_v25 = vpop.eup %2374 }
0x15f5   : > { %v1784_v27 = vpop.xlane.xlu0 %1783  ;;  %v1787_v28 = vmul.f32 %v2375_v25, %v2363_v43 }
0x15f6   : > { %2376 = vrcp.f32 %v1784_v27 }
0x15f7   : > { %1791 = vrot.lane.b32.xlu1 %v1787_v28, %s2671_s21  ;;  %2378 = vpow2.f32 %v1840_v26 }
0x15fc   : > { %v2377_v58 = vpop.eup %2376 }
0x15fd   : > { %v1788_v61 = vmul.f32 %v2377_v58, %v2365_v45  ;;  %v3089_v33 = vpop.eup %2378 }
0x15ff   : > { %1846 = vrot.lane.b32.xlu1 %v3089_v33, %s2670_s23  ;;  %1793 = vrot.lane.b32.xlu2 %v1788_v61, %s2671_s21 }
0x1608   : > { %v2252_v29 = vpop.permute.xlu0 %2251 }
0x1609   : > { %v2253_v30 = vunpack.i.l.bf16 %v2252_v29  ;;  %v2254_v31 = vunpack.i.h.bf16 %v2252_v29 }
0x160b   : > { %1825 = vmatpush.msra.mxu1 %v2253_v30 }
0x160d   : > { %1826 = vmatpush.msra.mxu1 %v2254_v31 }
0x162b   : > { %v1751_v1 = vpop.xlane.xlu2 %1750 }
0x162c   : > { %2380 = vrcp.f32 %v1751_v1 }
0x1632   : > { %v2381_v2 = vpop.eup %2380 }
0x1633   : > { %v1757_v32 = vmul.f32 %v2381_v2, %v2367_v59  ;;  %v1754_v34 = vpop.xlane.xlu2 %1753 }
0x1634   : > { %2382 = vrcp.f32 %v1754_v34 }
0x1635   : > { %2117 = vmatmul.msk.f32.vlgmr.msra.gmra.mxu1 %vm488_vm2, %v1757_v32  ;;  %2384 = vpow2.f32 %v2110_v39 }
0x163a   : > { %v2383_v16 = vpop.eup %2382 }
0x163b   : > { %v1758_v35 = vmul.f32 %v2383_v16, %v2369_v62  ;;  %v2385_v40 = vpop.eup %2384 }
0x163c   : > { %v1661_v41 = vadd.f32 1.0, %v2385_v40 }
0x163d   : > { %2118 = vmatmul.msk.f32.gmra.mxu1 %vm488_vm2, %v1758_v35 }
0x163e   : > { %2386 = vrcp.f32 %v1661_v41  ;;  %v1688_v49 = vand.u32 2147483648, %v1661_v41  ;;  %vm1682_vm9 = vweird.f32 %v1661_v41  ;;  %v1686_v50 = vand.u32 2147483647, %v1661_v41 }
0x1640   : > { %v1689_v53 = vor.u32 1.1754944e-38, %v1688_v49 }
0x1644   : > { %v2387_v42 = vpop.eup %2386 }
0x1645   : > { %v1678_v44 = vmul.f32 %v2387_v42, %v1661_v41  ;;  %vm1683_vm8 = vweird.f32 %v2387_v42 }
0x1646   : > { %vm1684_vm10 = vmor %vm1682_vm9, %vm1683_vm8 }
0x1647   : > { %v1679_v45 = vsub.f32 1.0, %v1678_v44 }
0x1649   : > { %v1680_v46 = vmul.f32 %v2387_v42, %v1679_v45 }
0x164b   : > { %v1681_v48 = vadd.f32 %v2387_v42, %v1680_v46 }
0x164d   : > { %v1685_v51 = vsel %vm1684_vm10, %v2387_v42, %v1681_v48 }
0x1659   : > { %v1794_v37 = vpop.permute.xlu2 %1793 }
0x1669   : > { %v1792_v36 = vpop.permute.xlu1 %1791 }
0x166a   : > { %2119 = vmatmul.msk.f32.gmra.mxu1 %vm488_vm2, %v1792_v36 }
0x1671   : > { %v1847_v3 = vpop.permute.xlu1 %1846 }
0x1672   : > { %2120 = vmatmul.msk.f32.gmra.mxu1 %vm488_vm2, %v1794_v37  ;;  %vm1687_vm2 = vcmp.eq.f32.partialorder %v1686_v50, 8.507059e+37  ;;  %v1852_v4 = vadd.f32 %v3089_v33, %v1847_v3 }
0x1673   : > { %v1690_v54 = vsel %vm1687_vm2, %v1689_v53, %v1685_v51 }
0x1674   : > { %v1842_v55 = vmul.f32 1.442695, %v1690_v54 }
0x1676   : > { %2388 = vpow2.f32 %v1842_v55 }
0x1677   : > { %2390 = vrcp.f32 %v1852_v4 }
0x167c   : > { %v2389_v57 = vpop.eup %2388 }
0x167d   : > { %v2391_v10 = vpop.eup %2390 }
0x16b2   : > { %v1828_v43 = vpop.f32.mrf.mxu1 }
0x16b3   : > { %v1856_v7 = vmul.f32 %v3089_v33, %v1828_v43 }
0x16ba   : > { %v1831_v47 = vpop.f32.mrf.mxu1 }
0x16e7   : > { %v1834_v52 = vpop.f32.mrf.mxu1 }
0x16e8   : > { %1860 = vrot.lane.b32.xlu0 %v1834_v52, %s2668_s9 }
0x16ef   : > { %v1837_v56 = vpop.f32.mrf.mxu1 }
0x16f0   : > { %1862 = vrot.lane.b32.xlu0 %v1837_v56, %s2668_s9 }
0x16f8   : > { %1848 = vrot.lane.b32.xlu0 %v2389_v57, %s2670_s23 }
0x1700   : > { %1880 = vrot.lane.b32.xlu0 %v3032_v8, %s2668_s9 }
0x175a   : > { %v1861_v59 = vpop.permute.xlu0 %1860 }
0x175b   : > { %v1866_v60 = vmul.f32 %v3089_v33, %v1861_v59 }
0x175d   : > { %1870 = vrot.lane.b32.xlu2 %v1866_v60, %s2670_s23 }
0x1762   : > { %v1863_v62 = vpop.permute.xlu0 %1862 }
0x1763   : > { %v1867_v63 = vmul.f32 %v2389_v57, %v1863_v62 }
0x1765   : > { %1882 = vrot.lane.b32.xlu2 %v3036_v15, %s2668_s9  ;;  %1872 = vrot.lane.b32.xlu1 %v1867_v63, %s2670_s23  ;;  %v1857_v15 = vmul.f32 %v2389_v57, %v1831_v47 }
0x176a   : > { %v1849_v12 = vpop.permute.xlu0 %1848 }
0x176b   : > { %v1853_v13 = vadd.f32 %v2389_v57, %v1849_v12 }
0x176d   : > { %2392 = vrcp.f32 %v1853_v13 }
0x1772   : > { %v1881_v20 = vpop.permute.xlu0 %1880 }
0x1773   : > { %v2393_v18 = vpop.eup %2392  ;;  %v1894_v21 = vsel %vm409_vm0, %v2958_v6, %v1881_v20 }
0x17b7   : > { %v1871_v8 = vpop.permute.xlu2 %1870 }
0x17b8   : > { %v1876_v9 = vadd.f32 %v1871_v8, %v1856_v7 }
0x17ba   : > { %v1878_v11 = vmul.f32 %v2391_v10, %v1876_v9 }
0x17bc   : > { %1888 = vrot.lane.b32.xlu1 %v1878_v11, %s2669_s19 }
0x17bf   : > { %v1883_v25 = vpop.permute.xlu2 %1882 }
0x17c0   : > { %v1895_v26 = vsel %vm409_vm0, %v2956_v0, %v1883_v25 }
0x17d7   : > { %v1873_v14 = vpop.permute.xlu1 %1872 }
0x17d8   : > { %v1877_v17 = vadd.f32 %v1873_v14, %v1857_v15 }
0x17da   : > { %v1879_v19 = vmul.f32 %v2393_v18, %v1877_v17 }
0x17dc   : > { %1890 = vrot.lane.b32.xlu0 %v1879_v19, %s2669_s19 }
0x182e   : > { %v1889_v22 = vpop.permute.xlu1 %1888 }
0x182f   : > { %v1896_v23 = vsel %vm667_vm4, %v1894_v21, %v1889_v22 }
0x1830   : > { %v1898_v24 = vsel %vm700_vm5, %v1896_v23, 0.0 }
0x1831   : > { %1900 = vst [vmem:[%s399_s16] sm:$0xff] %v1898_v24 }
0x184e   : > { %v1891_v27 = vpop.permute.xlu0 %1890 }
0x184f   : > { %v1897_v28 = vsel %vm667_vm4, %v1895_v26, %v1891_v27 }
0x1850   : > { %v1899_v58 = vsel %vm700_vm5, %v1897_v28, 0.0 }
0x1851   : > { %1901 = vst [vmem:[%s399_s16 + $0x8] sm:$0xff] %v1899_v58 }
0x1852 PF: > { %p20_p3 = scmp.ge.s32.totalorder %s2787_s14, 4   ;;  %s3153_s24 = smov %s2644_s25 }
0x1853   : > { %s3154_s25 = smov %s2648_s26  ;;  %s3155_s26 = smov %s2798_s20 }
0x1854   : > { %s3156_s27 = smov %s2787_s14  ;;  %22 = sbr.rel (!%p20_p3) target bundleno = 6 (0x6), region = 122 }
0x1859   :  { %1923 = vsyncpa [#allocation3], 1 }
0x185a   :  { %1925 = vsyncpa [#allocation3 + $0x1], 1 }
0x185b   :  { %1926 = vsyncpa [#allocation5], 1 }
0x185c   :  { %1927 = vsyncpa [#allocation8], 1 }
0x185d   :  { %1928 = vsyncpa [#allocation11], 1 }

</bundles_post_ra>
